<compile_context>
chip_gen: v7x
topology: tpu7x:2x2x1
jax: 0.10.0
libtpu: 0.0.40
codegen_flags: <defaults>
</compile_context>

<pallas_src>
import functools

import jax
import jax.numpy as jnp
import numpy as np
from jax.experimental import pallas as pl
from jax.experimental.pallas import tpu as pltpu


# ----------------------------------------------------------------------------
# Fused kernel: conv(im2col matmul) + ReLU + folded BN + BiLSTM(last step) +
# classifier MLP + sigmoid.  Everything stays in VMEM / vregs.
# ----------------------------------------------------------------------------
def fused_kernel(patch_ref, wc_ref, cb_ref, scale_ref, shift_ref,
                 wih_ref, bcat_ref, whf_ref,
                 w1_ref, b1_ref, w2_ref, b2_ref, o_ref, *, T, B, H):
    # patch_ref: (T*B, 3*Dp) im2col slab, row order t*B + b
    # wc_ref:    (3*Dp, C)   conv weight (tap-major, K zero-padded)
    # cb_ref/scale_ref/shift_ref: (1, C) conv bias / folded BN scale / shift
    # wih_ref:   (C, 8H)     [W_ih_fwd | W_ih_bwd]
    # bcat_ref:  (1, 8H)     [b_fwd | b_bwd]  (b_ih + b_hh folded per direction)
    # whf_ref:   (H, 4H)     forward-direction W_hh
    # w1/b1/w2/b2: classifier;  o_ref: (B, 1)

    # --- Conv1d(k=3, pad=1) as one K=3*Dp matmul, + bias + ReLU + BN(eval) ---
    conv = jnp.dot(patch_ref[...], wc_ref[...],
                   preferred_element_type=jnp.float32)           # (T*B, C)
    y = jnp.maximum(conv + cb_ref[...], 0.0)                     # bias + ReLU
    y = y * scale_ref[...] + shift_ref[...]                      # folded BN
    # Dropout (eval mode) = identity.

    # --- LSTM input projection for both directions, hoisted out of the loop ---
    z_in = (jnp.dot(y, wih_ref[...], preferred_element_type=jnp.float32)
            + bcat_ref[...])                                     # (T*B, 8H)

    def gates(z, c_prev):
        # PyTorch gate order (i, f, g, o)
        i = jax.nn.sigmoid(z[:, 0:H])
        f = jax.nn.sigmoid(z[:, H:2 * H])
        g = jnp.tanh(z[:, 2 * H:3 * H])
        o = jax.nn.sigmoid(z[:, 3 * H:4 * H])
        c = f * c_prev + i * g
        h = o * jnp.tanh(c)
        return h, c

    # Forward direction: full recurrence, unrolled (T small, static).  Only
    # h, c and the (H, 4H) W_hh tile are live across steps.
    whf = whf_ref[...]
    h = jnp.zeros((B, H), jnp.float32)
    c = jnp.zeros((B, H), jnp.float32)
    for t in range(T):
        z = (z_in[t * B:(t + 1) * B, 0:4 * H]
             + jnp.dot(h, whf, preferred_element_type=jnp.float32))
        h, c = gates(z, c)
    h_fwd = h

    # Reverse direction: lstm_out[:, -1, H:] is the reverse cell's FIRST step
    # (input x[T-1], zero initial state) => h0 @ W_hh == 0 and f*c0 == 0, so a
    # single gate evaluation is exact (NOTE: only valid because we consume the
    # last time step only).
    z_b = z_in[(T - 1) * B:T * B, 4 * H:8 * H]
    h_bwd, _ = gates(z_b, jnp.zeros((B, H), jnp.float32))

    # --- classifier: Linear(2H,64) -> ReLU -> (Dropout eval) -> Linear(64,1) ---
    feat = jnp.concatenate([h_fwd, h_bwd], axis=1)               # (B, 2H)
    hid = jnp.maximum(jnp.dot(feat, w1_ref[...],
                              preferred_element_type=jnp.float32)
                      + b1_ref[...], 0.0)
    logit = jnp.dot(hid, w2_ref[...],
                    preferred_element_type=jnp.float32) + b2_ref[...]
    o_ref[...] = jax.nn.sigmoid(logit)                           # (B, 1)


# ----------------------------------------------------------------------------
# Wrapper: pad / im2col / weight packing in plain XLA, then one pallas_call.
# ----------------------------------------------------------------------------
def cnn_lstm_forward(x, p):
    B, T, D = x.shape
    C = p["conv_w"].shape[2]          # 128
    H = p["whf"].shape[0]             # hidden_dim
    Dp = ((D + 127) // 128) * 128     # lane-align the feature dim (86 -> 128)

    # Zero-pad features to Dp and time by 1 on each side (conv padding=1);
    # zero padding is numerically exact.
    x_p = jnp.pad(x, ((0, 0), (1, 1), (0, Dp - D)))              # (B, T+2, Dp)

    # im2col of the k=3 window -> (B, T, 3*Dp); lay rows out as t*B + b so the
    # recurrence can take a contiguous (B, 4H) slab per time step.
    patches = jnp.concatenate([x_p[:, k:k + T, :] for k in range(3)], axis=-1)
    patches = patches.transpose(1, 0, 2).reshape(T * B, 3 * Dp)

    # Conv weight (3, D, C) -> zero-pad K dim -> (3*Dp, C) matching patch cols.
    wc = jnp.pad(p["conv_w"], ((0, 0), (0, Dp - D), (0, 0))).reshape(3 * Dp, C)

    # Both LSTM directions share one input-projection matmul.
    wih = jnp.concatenate([p["wif"], p["wib"]], axis=1)          # (C, 8H)
    bcat = jnp.concatenate([p["bf"], p["bb"]], axis=1)           # (1, 8H)

    args = (patches, wc, p["conv_b"], p["bn_scale"], p["bn_shift"],
            wih, bcat, p["whf"], p["w1"], p["b1"], p["w2"], p["b2"])
    in_specs = [pl.BlockSpec(a.shape, lambda *_, n=a.ndim: (0,) * n)
                for a in args]

    out = pl.pallas_call(
        functools.partial(fused_kernel, T=T, B=B, H=H),
        out_shape=jax.ShapeDtypeStruct((B, 1), jnp.float32),
        grid=(1,),
        in_specs=in_specs,
        out_specs=pl.BlockSpec((B, 1), lambda i: (0, 0)),
        compiler_params=pltpu.CompilerParams(
            dimension_semantics=("arbitrary",)),
    )(*args)
    return out[:, 0]                                             # squeeze(1)


# ----------------------------------------------------------------------------
# Pure-JAX reference (same math, no Pallas) for the correctness check.
# ----------------------------------------------------------------------------
def reference_forward(x, p):
    B, T, D = x.shape
    H = p["whf"].shape[0]
    x_pad = jnp.pad(x, ((0, 0), (1, 1), (0, 0)))
    conv = sum(jnp.einsum("btd,dc->btc", x_pad[:, k:k + T, :], p["conv_w"][k])
               for k in range(3))
    y = jnp.maximum(conv + p["conv_b"], 0.0) * p["bn_scale"] + p["bn_shift"]

    def cell(x_t, h, c, wih, whh, b):
        z = x_t @ wih + h @ whh + b
        i = jax.nn.sigmoid(z[:, 0:H])
        f = jax.nn.sigmoid(z[:, H:2 * H])
        g = jnp.tanh(z[:, 2 * H:3 * H])
        o = jax.nn.sigmoid(z[:, 3 * H:4 * H])
        c = f * c + i * g
        return o * jnp.tanh(c), c

    h = jnp.zeros((B, H)); c = jnp.zeros((B, H))
    for t in range(T):
        h, c = cell(y[:, t, :], h, c, p["wif"], p["whf"], p["bf"])
    hb, _ = cell(y[:, T - 1, :], jnp.zeros((B, H)), jnp.zeros((B, H)),
                 p["wib"], p["whb"], p["bb"])
    feat = jnp.concatenate([h, hb], axis=1)
    hid = jnp.maximum(feat @ p["w1"] + p["b1"], 0.0)
    return jax.nn.sigmoid(hid @ p["w2"] + p["b2"])[:, 0]


# ----------------------------------------------------------------------------
# Deterministic parameter construction (shapes from CNNLSTMClassifier.__init__)
# ----------------------------------------------------------------------------
def make_params(key, input_dim=86, hidden_dim=64, conv_ch=128):
    ks = jax.random.split(key, 14)
    n = lambda k, s: (0.1 * jax.random.normal(k, s)).astype(jnp.float32)
    eps = 1e-5
    gamma = n(ks[12], (1, conv_ch)) + 1.0
    beta = n(ks[13], (1, conv_ch))
    run_mean = jnp.zeros((1, conv_ch), jnp.float32)
    run_var = jnp.ones((1, conv_ch), jnp.float32)
    scale = gamma / jnp.sqrt(run_var + eps)
    shift = beta - run_mean * scale
    return {
        # Conv1d(input_dim, 128, k=3): PyTorch weight (128, D, 3) stored tap-major (3, D, 128)
        "conv_w": n(ks[0], (3, input_dim, conv_ch)),
        "conv_b": n(ks[1], (1, conv_ch)),
        "bn_scale": scale,
        "bn_shift": shift,
        # bidirectional LSTM, 1 layer: W_ih (4H, 128) / W_hh (4H, H) stored transposed,
        # b = b_ih + b_hh folded into one (1, 4H) vector per direction.
        "wif": n(ks[2], (conv_ch, 4 * hidden_dim)),
        "whf": n(ks[3], (hidden_dim, 4 * hidden_dim)),
        "bf":  n(ks[4], (1, 4 * hidden_dim)),
        "wib": n(ks[5], (conv_ch, 4 * hidden_dim)),
        "whb": n(ks[6], (hidden_dim, 4 * hidden_dim)),  # reference only (h0=0 => unused in kernel)
        "bb":  n(ks[7], (1, 4 * hidden_dim)),
        # classifier: Linear(2H, 64) -> ReLU -> Linear(64, 1) -> Sigmoid
        "w1": n(ks[8], (2 * hidden_dim, 64)),
        "b1": n(ks[9], (1, 64)),
        "w2": n(ks[10], (64, 1)),
        "b2": n(ks[11], (1, 1)),
    }


if __name__ == "__main__":
    key = jax.random.PRNGKey(0)
    k_x, k_p = jax.random.split(key)

    B, T, D = 2, 8, 86          # batch, sequence length, input_dim (module default)
    x = jax.random.normal(k_x, (B, T, D), dtype=jnp.float32)
    params = make_params(k_p, input_dim=D, hidden_dim=64)

    out = jax.block_until_ready(cnn_lstm_forward(x, params))
    ref = jax.block_until_ready(reference_forward(x, params))

    assert out.shape == (B,), out.shape
    np.testing.assert_allclose(np.asarray(out), np.asarray(ref),
                               rtol=1e-3, atol=1e-3)
    print("KERNEL_OK")
</pallas_src>

<mosaic_0001>
module attributes {stable_mosaic.version = 11 : i64} {
  func.func @fused_kernel(%arg0: i32, %arg1: memref<16x384xf32, #tpu.memory_space<vmem>>, %arg2: memref<384x128xf32, #tpu.memory_space<vmem>>, %arg3: memref<1x128xf32, #tpu.memory_space<vmem>>, %arg4: memref<1x128xf32, #tpu.memory_space<vmem>>, %arg5: memref<1x128xf32, #tpu.memory_space<vmem>>, %arg6: memref<128x512xf32, #tpu.memory_space<vmem>>, %arg7: memref<1x512xf32, #tpu.memory_space<vmem>>, %arg8: memref<64x256xf32, #tpu.memory_space<vmem>>, %arg9: memref<128x64xf32, #tpu.memory_space<vmem>>, %arg10: memref<1x64xf32, #tpu.memory_space<vmem>>, %arg11: memref<64x1xf32, #tpu.memory_space<vmem>>, %arg12: memref<1x1xf32, #tpu.memory_space<vmem>>, %arg13: memref<2x1xf32, #tpu.memory_space<vmem>>) attributes {dimension_semantics = [#tpu.dimension_semantics<arbitrary>], iteration_bounds = array<i64: 1>, scalar_prefetch = 0 : i64, scratch_operands = 0 : i64, tpu.core_type = #tpu.core_type<tc>, window_params = [{pipeline_mode = #tpu.pipeline_mode<synchronous>, transform_indices = @transform_0, window_bounds = array<i64: 16, 384>}, {pipeline_mode = #tpu.pipeline_mode<synchronous>, transform_indices = @transform_1, window_bounds = array<i64: 384, 128>}, {pipeline_mode = #tpu.pipeline_mode<synchronous>, transform_indices = @transform_2, window_bounds = array<i64: 1, 128>}, {pipeline_mode = #tpu.pipeline_mode<synchronous>, transform_indices = @transform_3, window_bounds = array<i64: 1, 128>}, {pipeline_mode = #tpu.pipeline_mode<synchronous>, transform_indices = @transform_4, window_bounds = array<i64: 1, 128>}, {pipeline_mode = #tpu.pipeline_mode<synchronous>, transform_indices = @transform_5, window_bounds = array<i64: 128, 512>}, {pipeline_mode = #tpu.pipeline_mode<synchronous>, transform_indices = @transform_6, window_bounds = array<i64: 1, 512>}, {pipeline_mode = #tpu.pipeline_mode<synchronous>, transform_indices = @transform_7, window_bounds = array<i64: 64, 256>}, {pipeline_mode = #tpu.pipeline_mode<synchronous>, transform_indices = @transform_8, window_bounds = array<i64: 128, 64>}, {pipeline_mode = #tpu.pipeline_mode<synchronous>, transform_indices = @transform_9, window_bounds = array<i64: 1, 64>}, {pipeline_mode = #tpu.pipeline_mode<synchronous>, transform_indices = @transform_10, window_bounds = array<i64: 64, 1>}, {pipeline_mode = #tpu.pipeline_mode<synchronous>, transform_indices = @transform_11, window_bounds = array<i64: 1, 1>}, {pipeline_mode = #tpu.pipeline_mode<synchronous>, transform_indices = @transform_12, window_bounds = array<i64: 2, 1>}]} {
    %c0 = arith.constant 0 : index
    %c0_0 = arith.constant 0 : index
    %0 = vector.load %arg1[%c0, %c0_0] : memref<16x384xf32, #tpu.memory_space<vmem>>, vector<16x384xf32>
    %c0_1 = arith.constant 0 : index
    %c0_2 = arith.constant 0 : index
    %1 = vector.load %arg2[%c0_1, %c0_2] : memref<384x128xf32, #tpu.memory_space<vmem>>, vector<384x128xf32>
    %cst = arith.constant dense<0.000000e+00> : vector<16x128xf32>
    %2 = tpu.matmul %0, %1, %cst {dimension_numbers = #tpu.dot_dimension_numbers<[1], [0], [0], [1], [0, 0, 1, 1], [], []>} : vector<16x384xf32>, vector<384x128xf32>, vector<16x128xf32> -> vector<16x128xf32>
    %c0_3 = arith.constant 0 : index
    %c0_4 = arith.constant 0 : index
    %3 = vector.load %arg3[%c0_3, %c0_4] : memref<1x128xf32, #tpu.memory_space<vmem>>, vector<1x128xf32>
    %4 = vector.broadcast %3 : vector<1x128xf32> to vector<16x128xf32>
    %5 = arith.addf %2, %4 : vector<16x128xf32>
    %cst_5 = arith.constant 0.000000e+00 : f32
    %6 = vector.broadcast %cst_5 : f32 to vector<16x128xf32>
    %7 = arith.maximumf %5, %6 : vector<16x128xf32>
    %c0_6 = arith.constant 0 : index
    %c0_7 = arith.constant 0 : index
    %8 = vector.load %arg4[%c0_6, %c0_7] : memref<1x128xf32, #tpu.memory_space<vmem>>, vector<1x128xf32>
    %9 = vector.broadcast %8 : vector<1x128xf32> to vector<16x128xf32>
    %10 = arith.mulf %7, %9 : vector<16x128xf32>
    %c0_8 = arith.constant 0 : index
    %c0_9 = arith.constant 0 : index
    %11 = vector.load %arg5[%c0_8, %c0_9] : memref<1x128xf32, #tpu.memory_space<vmem>>, vector<1x128xf32>
    %12 = vector.broadcast %11 : vector<1x128xf32> to vector<16x128xf32>
    %13 = arith.addf %10, %12 : vector<16x128xf32>
    %c0_10 = arith.constant 0 : index
    %c0_11 = arith.constant 0 : index
    %14 = vector.load %arg6[%c0_10, %c0_11] : memref<128x512xf32, #tpu.memory_space<vmem>>, vector<128x512xf32>
    %cst_12 = arith.constant dense<0.000000e+00> : vector<16x512xf32>
    %15 = tpu.matmul %13, %14, %cst_12 {dimension_numbers = #tpu.dot_dimension_numbers<[1], [0], [0], [1], [0, 0, 1, 1], [], []>} : vector<16x128xf32>, vector<128x512xf32>, vector<16x512xf32> -> vector<16x512xf32>
    %c0_13 = arith.constant 0 : index
    %c0_14 = arith.constant 0 : index
    %16 = vector.load %arg7[%c0_13, %c0_14] : memref<1x512xf32, #tpu.memory_space<vmem>>, vector<1x512xf32>
    %17 = vector.broadcast %16 : vector<1x512xf32> to vector<16x512xf32>
    %18 = arith.addf %15, %17 : vector<16x512xf32>
    %c0_15 = arith.constant 0 : index
    %c0_16 = arith.constant 0 : index
    %19 = vector.load %arg8[%c0_15, %c0_16] : memref<64x256xf32, #tpu.memory_space<vmem>>, vector<64x256xf32>
    %cst_17 = arith.constant 0.000000e+00 : f32
    %20 = vector.broadcast %cst_17 : f32 to vector<2x64xf32>
    %cst_18 = arith.constant 0.000000e+00 : f32
    %21 = vector.broadcast %cst_18 : f32 to vector<2x64xf32>
    %22 = vector.extract_strided_slice %18 {offsets = [0, 0], sizes = [2, 256], strides = [1, 1]} : vector<16x512xf32> to vector<2x256xf32>
    %cst_19 = arith.constant dense<0.000000e+00> : vector<2x256xf32>
    %23 = tpu.matmul %20, %19, %cst_19 {dimension_numbers = #tpu.dot_dimension_numbers<[1], [0], [0], [1], [0, 0, 1, 1], [], []>} : vector<2x64xf32>, vector<64x256xf32>, vector<2x256xf32> -> vector<2x256xf32>
    %24 = arith.addf %22, %23 : vector<2x256xf32>
    %25 = vector.extract_strided_slice %24 {offsets = [0, 0], sizes = [2, 64], strides = [1, 1]} : vector<2x256xf32> to vector<2x64xf32>
    %26 = arith.negf %25 : vector<2x64xf32>
    %27 = math.exp %26 : vector<2x64xf32>
    %cst_20 = arith.constant 1.000000e+00 : f32
    %28 = vector.broadcast %cst_20 : f32 to vector<2x64xf32>
    %29 = arith.addf %28, %27 : vector<2x64xf32>
    %30 = arith.divf %28, %29 : vector<2x64xf32>
    %31 = vector.extract_strided_slice %24 {offsets = [0, 64], sizes = [2, 64], strides = [1, 1]} : vector<2x256xf32> to vector<2x64xf32>
    %32 = arith.negf %31 : vector<2x64xf32>
    %33 = math.exp %32 : vector<2x64xf32>
    %cst_21 = arith.constant 1.000000e+00 : f32
    %34 = vector.broadcast %cst_21 : f32 to vector<2x64xf32>
    %35 = arith.addf %34, %33 : vector<2x64xf32>
    %36 = arith.divf %34, %35 : vector<2x64xf32>
    %37 = vector.extract_strided_slice %24 {offsets = [0, 128], sizes = [2, 64], strides = [1, 1]} : vector<2x256xf32> to vector<2x64xf32>
    %38 = math.tanh %37 : vector<2x64xf32>
    %39 = vector.extract_strided_slice %24 {offsets = [0, 192], sizes = [2, 64], strides = [1, 1]} : vector<2x256xf32> to vector<2x64xf32>
    %40 = arith.negf %39 : vector<2x64xf32>
    %41 = math.exp %40 : vector<2x64xf32>
    %cst_22 = arith.constant 1.000000e+00 : f32
    %42 = vector.broadcast %cst_22 : f32 to vector<2x64xf32>
    %43 = arith.addf %42, %41 : vector<2x64xf32>
    %44 = arith.divf %42, %43 : vector<2x64xf32>
    %45 = arith.mulf %36, %21 : vector<2x64xf32>
    %46 = arith.mulf %30, %38 : vector<2x64xf32>
    %47 = arith.addf %45, %46 : vector<2x64xf32>
    %48 = math.tanh %47 : vector<2x64xf32>
    %49 = arith.mulf %44, %48 : vector<2x64xf32>
    %50 = vector.extract_strided_slice %18 {offsets = [2, 0], sizes = [2, 256], strides = [1, 1]} : vector<16x512xf32> to vector<2x256xf32>
    %cst_23 = arith.constant dense<0.000000e+00> : vector<2x256xf32>
    %51 = tpu.matmul %49, %19, %cst_23 {dimension_numbers = #tpu.dot_dimension_numbers<[1], [0], [0], [1], [0, 0, 1, 1], [], []>} : vector<2x64xf32>, vector<64x256xf32>, vector<2x256xf32> -> vector<2x256xf32>
    %52 = arith.addf %50, %51 : vector<2x256xf32>
    %53 = vector.extract_strided_slice %52 {offsets = [0, 0], sizes = [2, 64], strides = [1, 1]} : vector<2x256xf32> to vector<2x64xf32>
    %54 = arith.negf %53 : vector<2x64xf32>
    %55 = math.exp %54 : vector<2x64xf32>
    %cst_24 = arith.constant 1.000000e+00 : f32
    %56 = vector.broadcast %cst_24 : f32 to vector<2x64xf32>
    %57 = arith.addf %56, %55 : vector<2x64xf32>
    %58 = arith.divf %56, %57 : vector<2x64xf32>
    %59 = vector.extract_strided_slice %52 {offsets = [0, 64], sizes = [2, 64], strides = [1, 1]} : vector<2x256xf32> to vector<2x64xf32>
    %60 = arith.negf %59 : vector<2x64xf32>
    %61 = math.exp %60 : vector<2x64xf32>
    %cst_25 = arith.constant 1.000000e+00 : f32
    %62 = vector.broadcast %cst_25 : f32 to vector<2x64xf32>
    %63 = arith.addf %62, %61 : vector<2x64xf32>
    %64 = arith.divf %62, %63 : vector<2x64xf32>
    %65 = vector.extract_strided_slice %52 {offsets = [0, 128], sizes = [2, 64], strides = [1, 1]} : vector<2x256xf32> to vector<2x64xf32>
    %66 = math.tanh %65 : vector<2x64xf32>
    %67 = vector.extract_strided_slice %52 {offsets = [0, 192], sizes = [2, 64], strides = [1, 1]} : vector<2x256xf32> to vector<2x64xf32>
    %68 = arith.negf %67 : vector<2x64xf32>
    %69 = math.exp %68 : vector<2x64xf32>
    %cst_26 = arith.constant 1.000000e+00 : f32
    %70 = vector.broadcast %cst_26 : f32 to vector<2x64xf32>
    %71 = arith.addf %70, %69 : vector<2x64xf32>
    %72 = arith.divf %70, %71 : vector<2x64xf32>
    %73 = arith.mulf %64, %47 : vector<2x64xf32>
    %74 = arith.mulf %58, %66 : vector<2x64xf32>
    %75 = arith.addf %73, %74 : vector<2x64xf32>
    %76 = math.tanh %75 : vector<2x64xf32>
    %77 = arith.mulf %72, %76 : vector<2x64xf32>
    %78 = vector.extract_strided_slice %18 {offsets = [4, 0], sizes = [2, 256], strides = [1, 1]} : vector<16x512xf32> to vector<2x256xf32>
    %cst_27 = arith.constant dense<0.000000e+00> : vector<2x256xf32>
    %79 = tpu.matmul %77, %19, %cst_27 {dimension_numbers = #tpu.dot_dimension_numbers<[1], [0], [0], [1], [0, 0, 1, 1], [], []>} : vector<2x64xf32>, vector<64x256xf32>, vector<2x256xf32> -> vector<2x256xf32>
    %80 = arith.addf %78, %79 : vector<2x256xf32>
    %81 = vector.extract_strided_slice %80 {offsets = [0, 0], sizes = [2, 64], strides = [1, 1]} : vector<2x256xf32> to vector<2x64xf32>
    %82 = arith.negf %81 : vector<2x64xf32>
    %83 = math.exp %82 : vector<2x64xf32>
    %cst_28 = arith.constant 1.000000e+00 : f32
    %84 = vector.broadcast %cst_28 : f32 to vector<2x64xf32>
    %85 = arith.addf %84, %83 : vector<2x64xf32>
    %86 = arith.divf %84, %85 : vector<2x64xf32>
    %87 = vector.extract_strided_slice %80 {offsets = [0, 64], sizes = [2, 64], strides = [1, 1]} : vector<2x256xf32> to vector<2x64xf32>
    %88 = arith.negf %87 : vector<2x64xf32>
    %89 = math.exp %88 : vector<2x64xf32>
    %cst_29 = arith.constant 1.000000e+00 : f32
    %90 = vector.broadcast %cst_29 : f32 to vector<2x64xf32>
    %91 = arith.addf %90, %89 : vector<2x64xf32>
    %92 = arith.divf %90, %91 : vector<2x64xf32>
    %93 = vector.extract_strided_slice %80 {offsets = [0, 128], sizes = [2, 64], strides = [1, 1]} : vector<2x256xf32> to vector<2x64xf32>
    %94 = math.tanh %93 : vector<2x64xf32>
    %95 = vector.extract_strided_slice %80 {offsets = [0, 192], sizes = [2, 64], strides = [1, 1]} : vector<2x256xf32> to vector<2x64xf32>
    %96 = arith.negf %95 : vector<2x64xf32>
    %97 = math.exp %96 : vector<2x64xf32>
    %cst_30 = arith.constant 1.000000e+00 : f32
    %98 = vector.broadcast %cst_30 : f32 to vector<2x64xf32>
    %99 = arith.addf %98, %97 : vector<2x64xf32>
    %100 = arith.divf %98, %99 : vector<2x64xf32>
    %101 = arith.mulf %92, %75 : vector<2x64xf32>
    %102 = arith.mulf %86, %94 : vector<2x64xf32>
    %103 = arith.addf %101, %102 : vector<2x64xf32>
    %104 = math.tanh %103 : vector<2x64xf32>
    %105 = arith.mulf %100, %104 : vector<2x64xf32>
    %106 = vector.extract_strided_slice %18 {offsets = [6, 0], sizes = [2, 256], strides = [1, 1]} : vector<16x512xf32> to vector<2x256xf32>
    %cst_31 = arith.constant dense<0.000000e+00> : vector<2x256xf32>
    %107 = tpu.matmul %105, %19, %cst_31 {dimension_numbers = #tpu.dot_dimension_numbers<[1], [0], [0], [1], [0, 0, 1, 1], [], []>} : vector<2x64xf32>, vector<64x256xf32>, vector<2x256xf32> -> vector<2x256xf32>
    %108 = arith.addf %106, %107 : vector<2x256xf32>
    %109 = vector.extract_strided_slice %108 {offsets = [0, 0], sizes = [2, 64], strides = [1, 1]} : vector<2x256xf32> to vector<2x64xf32>
    %110 = arith.negf %109 : vector<2x64xf32>
    %111 = math.exp %110 : vector<2x64xf32>
    %cst_32 = arith.constant 1.000000e+00 : f32
    %112 = vector.broadcast %cst_32 : f32 to vector<2x64xf32>
    %113 = arith.addf %112, %111 : vector<2x64xf32>
    %114 = arith.divf %112, %113 : vector<2x64xf32>
    %115 = vector.extract_strided_slice %108 {offsets = [0, 64], sizes = [2, 64], strides = [1, 1]} : vector<2x256xf32> to vector<2x64xf32>
    %116 = arith.negf %115 : vector<2x64xf32>
    %117 = math.exp %116 : vector<2x64xf32>
    %cst_33 = arith.constant 1.000000e+00 : f32
    %118 = vector.broadcast %cst_33 : f32 to vector<2x64xf32>
    %119 = arith.addf %118, %117 : vector<2x64xf32>
    %120 = arith.divf %118, %119 : vector<2x64xf32>
    %121 = vector.extract_strided_slice %108 {offsets = [0, 128], sizes = [2, 64], strides = [1, 1]} : vector<2x256xf32> to vector<2x64xf32>
    %122 = math.tanh %121 : vector<2x64xf32>
    %123 = vector.extract_strided_slice %108 {offsets = [0, 192], sizes = [2, 64], strides = [1, 1]} : vector<2x256xf32> to vector<2x64xf32>
    %124 = arith.negf %123 : vector<2x64xf32>
    %125 = math.exp %124 : vector<2x64xf32>
    %cst_34 = arith.constant 1.000000e+00 : f32
    %126 = vector.broadcast %cst_34 : f32 to vector<2x64xf32>
    %127 = arith.addf %126, %125 : vector<2x64xf32>
    %128 = arith.divf %126, %127 : vector<2x64xf32>
    %129 = arith.mulf %120, %103 : vector<2x64xf32>
    %130 = arith.mulf %114, %122 : vector<2x64xf32>
    %131 = arith.addf %129, %130 : vector<2x64xf32>
    %132 = math.tanh %131 : vector<2x64xf32>
    %133 = arith.mulf %128, %132 : vector<2x64xf32>
    %134 = vector.extract_strided_slice %18 {offsets = [8, 0], sizes = [2, 256], strides = [1, 1]} : vector<16x512xf32> to vector<2x256xf32>
    %cst_35 = arith.constant dense<0.000000e+00> : vector<2x256xf32>
    %135 = tpu.matmul %133, %19, %cst_35 {dimension_numbers = #tpu.dot_dimension_numbers<[1], [0], [0], [1], [0, 0, 1, 1], [], []>} : vector<2x64xf32>, vector<64x256xf32>, vector<2x256xf32> -> vector<2x256xf32>
    %136 = arith.addf %134, %135 : vector<2x256xf32>
    %137 = vector.extract_strided_slice %136 {offsets = [0, 0], sizes = [2, 64], strides = [1, 1]} : vector<2x256xf32> to vector<2x64xf32>
    %138 = arith.negf %137 : vector<2x64xf32>
    %139 = math.exp %138 : vector<2x64xf32>
    %cst_36 = arith.constant 1.000000e+00 : f32
    %140 = vector.broadcast %cst_36 : f32 to vector<2x64xf32>
    %141 = arith.addf %140, %139 : vector<2x64xf32>
    %142 = arith.divf %140, %141 : vector<2x64xf32>
    %143 = vector.extract_strided_slice %136 {offsets = [0, 64], sizes = [2, 64], strides = [1, 1]} : vector<2x256xf32> to vector<2x64xf32>
    %144 = arith.negf %143 : vector<2x64xf32>
    %145 = math.exp %144 : vector<2x64xf32>
    %cst_37 = arith.constant 1.000000e+00 : f32
    %146 = vector.broadcast %cst_37 : f32 to vector<2x64xf32>
    %147 = arith.addf %146, %145 : vector<2x64xf32>
    %148 = arith.divf %146, %147 : vector<2x64xf32>
    %149 = vector.extract_strided_slice %136 {offsets = [0, 128], sizes = [2, 64], strides = [1, 1]} : vector<2x256xf32> to vector<2x64xf32>
    %150 = math.tanh %149 : vector<2x64xf32>
    %151 = vector.extract_strided_slice %136 {offsets = [0, 192], sizes = [2, 64], strides = [1, 1]} : vector<2x256xf32> to vector<2x64xf32>
    %152 = arith.negf %151 : vector<2x64xf32>
    %153 = math.exp %152 : vector<2x64xf32>
    %cst_38 = arith.constant 1.000000e+00 : f32
    %154 = vector.broadcast %cst_38 : f32 to vector<2x64xf32>
    %155 = arith.addf %154, %153 : vector<2x64xf32>
    %156 = arith.divf %154, %155 : vector<2x64xf32>
    %157 = arith.mulf %148, %131 : vector<2x64xf32>
    %158 = arith.mulf %142, %150 : vector<2x64xf32>
    %159 = arith.addf %157, %158 : vector<2x64xf32>
    %160 = math.tanh %159 : vector<2x64xf32>
    %161 = arith.mulf %156, %160 : vector<2x64xf32>
    %162 = vector.extract_strided_slice %18 {offsets = [10, 0], sizes = [2, 256], strides = [1, 1]} : vector<16x512xf32> to vector<2x256xf32>
    %cst_39 = arith.constant dense<0.000000e+00> : vector<2x256xf32>
    %163 = tpu.matmul %161, %19, %cst_39 {dimension_numbers = #tpu.dot_dimension_numbers<[1], [0], [0], [1], [0, 0, 1, 1], [], []>} : vector<2x64xf32>, vector<64x256xf32>, vector<2x256xf32> -> vector<2x256xf32>
    %164 = arith.addf %162, %163 : vector<2x256xf32>
    %165 = vector.extract_strided_slice %164 {offsets = [0, 0], sizes = [2, 64], strides = [1, 1]} : vector<2x256xf32> to vector<2x64xf32>
    %166 = arith.negf %165 : vector<2x64xf32>
    %167 = math.exp %166 : vector<2x64xf32>
    %cst_40 = arith.constant 1.000000e+00 : f32
    %168 = vector.broadcast %cst_40 : f32 to vector<2x64xf32>
    %169 = arith.addf %168, %167 : vector<2x64xf32>
    %170 = arith.divf %168, %169 : vector<2x64xf32>
    %171 = vector.extract_strided_slice %164 {offsets = [0, 64], sizes = [2, 64], strides = [1, 1]} : vector<2x256xf32> to vector<2x64xf32>
    %172 = arith.negf %171 : vector<2x64xf32>
    %173 = math.exp %172 : vector<2x64xf32>
    %cst_41 = arith.constant 1.000000e+00 : f32
    %174 = vector.broadcast %cst_41 : f32 to vector<2x64xf32>
    %175 = arith.addf %174, %173 : vector<2x64xf32>
    %176 = arith.divf %174, %175 : vector<2x64xf32>
    %177 = vector.extract_strided_slice %164 {offsets = [0, 128], sizes = [2, 64], strides = [1, 1]} : vector<2x256xf32> to vector<2x64xf32>
    %178 = math.tanh %177 : vector<2x64xf32>
    %179 = vector.extract_strided_slice %164 {offsets = [0, 192], sizes = [2, 64], strides = [1, 1]} : vector<2x256xf32> to vector<2x64xf32>
    %180 = arith.negf %179 : vector<2x64xf32>
    %181 = math.exp %180 : vector<2x64xf32>
    %cst_42 = arith.constant 1.000000e+00 : f32
    %182 = vector.broadcast %cst_42 : f32 to vector<2x64xf32>
    %183 = arith.addf %182, %181 : vector<2x64xf32>
    %184 = arith.divf %182, %183 : vector<2x64xf32>
    %185 = arith.mulf %176, %159 : vector<2x64xf32>
    %186 = arith.mulf %170, %178 : vector<2x64xf32>
    %187 = arith.addf %185, %186 : vector<2x64xf32>
    %188 = math.tanh %187 : vector<2x64xf32>
    %189 = arith.mulf %184, %188 : vector<2x64xf32>
    %190 = vector.extract_strided_slice %18 {offsets = [12, 0], sizes = [2, 256], strides = [1, 1]} : vector<16x512xf32> to vector<2x256xf32>
    %cst_43 = arith.constant dense<0.000000e+00> : vector<2x256xf32>
    %191 = tpu.matmul %189, %19, %cst_43 {dimension_numbers = #tpu.dot_dimension_numbers<[1], [0], [0], [1], [0, 0, 1, 1], [], []>} : vector<2x64xf32>, vector<64x256xf32>, vector<2x256xf32> -> vector<2x256xf32>
    %192 = arith.addf %190, %191 : vector<2x256xf32>
    %193 = vector.extract_strided_slice %192 {offsets = [0, 0], sizes = [2, 64], strides = [1, 1]} : vector<2x256xf32> to vector<2x64xf32>
    %194 = arith.negf %193 : vector<2x64xf32>
    %195 = math.exp %194 : vector<2x64xf32>
    %cst_44 = arith.constant 1.000000e+00 : f32
    %196 = vector.broadcast %cst_44 : f32 to vector<2x64xf32>
    %197 = arith.addf %196, %195 : vector<2x64xf32>
    %198 = arith.divf %196, %197 : vector<2x64xf32>
    %199 = vector.extract_strided_slice %192 {offsets = [0, 64], sizes = [2, 64], strides = [1, 1]} : vector<2x256xf32> to vector<2x64xf32>
    %200 = arith.negf %199 : vector<2x64xf32>
    %201 = math.exp %200 : vector<2x64xf32>
    %cst_45 = arith.constant 1.000000e+00 : f32
    %202 = vector.broadcast %cst_45 : f32 to vector<2x64xf32>
    %203 = arith.addf %202, %201 : vector<2x64xf32>
    %204 = arith.divf %202, %203 : vector<2x64xf32>
    %205 = vector.extract_strided_slice %192 {offsets = [0, 128], sizes = [2, 64], strides = [1, 1]} : vector<2x256xf32> to vector<2x64xf32>
    %206 = math.tanh %205 : vector<2x64xf32>
    %207 = vector.extract_strided_slice %192 {offsets = [0, 192], sizes = [2, 64], strides = [1, 1]} : vector<2x256xf32> to vector<2x64xf32>
    %208 = arith.negf %207 : vector<2x64xf32>
    %209 = math.exp %208 : vector<2x64xf32>
    %cst_46 = arith.constant 1.000000e+00 : f32
    %210 = vector.broadcast %cst_46 : f32 to vector<2x64xf32>
    %211 = arith.addf %210, %209 : vector<2x64xf32>
    %212 = arith.divf %210, %211 : vector<2x64xf32>
    %213 = arith.mulf %204, %187 : vector<2x64xf32>
    %214 = arith.mulf %198, %206 : vector<2x64xf32>
    %215 = arith.addf %213, %214 : vector<2x64xf32>
    %216 = math.tanh %215 : vector<2x64xf32>
    %217 = arith.mulf %212, %216 : vector<2x64xf32>
    %218 = vector.extract_strided_slice %18 {offsets = [14, 0], sizes = [2, 256], strides = [1, 1]} : vector<16x512xf32> to vector<2x256xf32>
    %cst_47 = arith.constant dense<0.000000e+00> : vector<2x256xf32>
    %219 = tpu.matmul %217, %19, %cst_47 {dimension_numbers = #tpu.dot_dimension_numbers<[1], [0], [0], [1], [0, 0, 1, 1], [], []>} : vector<2x64xf32>, vector<64x256xf32>, vector<2x256xf32> -> vector<2x256xf32>
    %220 = arith.addf %218, %219 : vector<2x256xf32>
    %221 = vector.extract_strided_slice %220 {offsets = [0, 0], sizes = [2, 64], strides = [1, 1]} : vector<2x256xf32> to vector<2x64xf32>
    %222 = arith.negf %221 : vector<2x64xf32>
    %223 = math.exp %222 : vector<2x64xf32>
    %cst_48 = arith.constant 1.000000e+00 : f32
    %224 = vector.broadcast %cst_48 : f32 to vector<2x64xf32>
    %225 = arith.addf %224, %223 : vector<2x64xf32>
    %226 = arith.divf %224, %225 : vector<2x64xf32>
    %227 = vector.extract_strided_slice %220 {offsets = [0, 64], sizes = [2, 64], strides = [1, 1]} : vector<2x256xf32> to vector<2x64xf32>
    %228 = arith.negf %227 : vector<2x64xf32>
    %229 = math.exp %228 : vector<2x64xf32>
    %cst_49 = arith.constant 1.000000e+00 : f32
    %230 = vector.broadcast %cst_49 : f32 to vector<2x64xf32>
    %231 = arith.addf %230, %229 : vector<2x64xf32>
    %232 = arith.divf %230, %231 : vector<2x64xf32>
    %233 = vector.extract_strided_slice %220 {offsets = [0, 128], sizes = [2, 64], strides = [1, 1]} : vector<2x256xf32> to vector<2x64xf32>
    %234 = math.tanh %233 : vector<2x64xf32>
    %235 = vector.extract_strided_slice %220 {offsets = [0, 192], sizes = [2, 64], strides = [1, 1]} : vector<2x256xf32> to vector<2x64xf32>
    %236 = arith.negf %235 : vector<2x64xf32>
    %237 = math.exp %236 : vector<2x64xf32>
    %cst_50 = arith.constant 1.000000e+00 : f32
    %238 = vector.broadcast %cst_50 : f32 to vector<2x64xf32>
    %239 = arith.addf %238, %237 : vector<2x64xf32>
    %240 = arith.divf %238, %239 : vector<2x64xf32>
    %241 = arith.mulf %232, %215 : vector<2x64xf32>
    %242 = arith.mulf %226, %234 : vector<2x64xf32>
    %243 = arith.addf %241, %242 : vector<2x64xf32>
    %244 = math.tanh %243 : vector<2x64xf32>
    %245 = arith.mulf %240, %244 : vector<2x64xf32>
    %246 = vector.extract_strided_slice %18 {offsets = [14, 256], sizes = [2, 256], strides = [1, 1]} : vector<16x512xf32> to vector<2x256xf32>
    %cst_51 = arith.constant 0.000000e+00 : f32
    %247 = vector.broadcast %cst_51 : f32 to vector<2x64xf32>
    %248 = vector.extract_strided_slice %246 {offsets = [0, 0], sizes = [2, 64], strides = [1, 1]} : vector<2x256xf32> to vector<2x64xf32>
    %249 = arith.negf %248 : vector<2x64xf32>
    %250 = math.exp %249 : vector<2x64xf32>
    %cst_52 = arith.constant 1.000000e+00 : f32
    %251 = vector.broadcast %cst_52 : f32 to vector<2x64xf32>
    %252 = arith.addf %251, %250 : vector<2x64xf32>
    %253 = arith.divf %251, %252 : vector<2x64xf32>
    %254 = vector.extract_strided_slice %246 {offsets = [0, 64], sizes = [2, 64], strides = [1, 1]} : vector<2x256xf32> to vector<2x64xf32>
    %255 = arith.negf %254 : vector<2x64xf32>
    %256 = math.exp %255 : vector<2x64xf32>
    %cst_53 = arith.constant 1.000000e+00 : f32
    %257 = vector.broadcast %cst_53 : f32 to vector<2x64xf32>
    %258 = arith.addf %257, %256 : vector<2x64xf32>
    %259 = arith.divf %257, %258 : vector<2x64xf32>
    %260 = vector.extract_strided_slice %246 {offsets = [0, 128], sizes = [2, 64], strides = [1, 1]} : vector<2x256xf32> to vector<2x64xf32>
    %261 = math.tanh %260 : vector<2x64xf32>
    %262 = vector.extract_strided_slice %246 {offsets = [0, 192], sizes = [2, 64], strides = [1, 1]} : vector<2x256xf32> to vector<2x64xf32>
    %263 = arith.negf %262 : vector<2x64xf32>
    %264 = math.exp %263 : vector<2x64xf32>
    %cst_54 = arith.constant 1.000000e+00 : f32
    %265 = vector.broadcast %cst_54 : f32 to vector<2x64xf32>
    %266 = arith.addf %265, %264 : vector<2x64xf32>
    %267 = arith.divf %265, %266 : vector<2x64xf32>
    %268 = arith.mulf %259, %247 : vector<2x64xf32>
    %269 = arith.mulf %253, %261 : vector<2x64xf32>
    %270 = arith.addf %268, %269 : vector<2x64xf32>
    %271 = math.tanh %270 : vector<2x64xf32>
    %272 = arith.mulf %267, %271 : vector<2x64xf32>
    %273 = tpu.concatenate %245, %272 in 1 : vector<2x64xf32>, vector<2x64xf32> -> vector<2x128xf32>
    %c0_55 = arith.constant 0 : index
    %c0_56 = arith.constant 0 : index
    %274 = vector.load %arg9[%c0_55, %c0_56] : memref<128x64xf32, #tpu.memory_space<vmem>>, vector<128x64xf32>
    %cst_57 = arith.constant dense<0.000000e+00> : vector<2x64xf32>
    %275 = tpu.matmul %273, %274, %cst_57 {dimension_numbers = #tpu.dot_dimension_numbers<[1], [0], [0], [1], [0, 0, 1, 1], [], []>} : vector<2x128xf32>, vector<128x64xf32>, vector<2x64xf32> -> vector<2x64xf32>
    %c0_58 = arith.constant 0 : index
    %c0_59 = arith.constant 0 : index
    %276 = vector.load %arg10[%c0_58, %c0_59] : memref<1x64xf32, #tpu.memory_space<vmem>>, vector<1x64xf32>
    %277 = vector.broadcast %276 : vector<1x64xf32> to vector<2x64xf32>
    %278 = arith.addf %275, %277 : vector<2x64xf32>
    %cst_60 = arith.constant 0.000000e+00 : f32
    %279 = vector.broadcast %cst_60 : f32 to vector<2x64xf32>
    %280 = arith.maximumf %278, %279 : vector<2x64xf32>
    %c0_61 = arith.constant 0 : index
    %c0_62 = arith.constant 0 : index
    %281 = vector.load %arg11[%c0_61, %c0_62] : memref<64x1xf32, #tpu.memory_space<vmem>>, vector<64x1xf32>
    %cst_63 = arith.constant dense<0.000000e+00> : vector<2x1xf32>
    %282 = tpu.matmul %280, %281, %cst_63 {dimension_numbers = #tpu.dot_dimension_numbers<[1], [0], [0], [1], [0, 0, 1, 1], [], []>} : vector<2x64xf32>, vector<64x1xf32>, vector<2x1xf32> -> vector<2x1xf32>
    %c0_64 = arith.constant 0 : index
    %c0_65 = arith.constant 0 : index
    %283 = vector.load %arg12[%c0_64, %c0_65] : memref<1x1xf32, #tpu.memory_space<vmem>>, vector<1x1xf32>
    %284 = vector.broadcast %283 : vector<1x1xf32> to vector<2x1xf32>
    %285 = arith.addf %282, %284 : vector<2x1xf32>
    %286 = arith.negf %285 : vector<2x1xf32>
    %287 = math.exp %286 : vector<2x1xf32>
    %cst_66 = arith.constant 1.000000e+00 : f32
    %288 = vector.broadcast %cst_66 : f32 to vector<2x1xf32>
    %289 = arith.addf %288, %287 : vector<2x1xf32>
    %290 = arith.divf %288, %289 : vector<2x1xf32>
    %c0_67 = arith.constant 0 : index
    %c0_68 = arith.constant 0 : index
    %291 = vector.load %arg13[%c0_67, %c0_68] : memref<2x1xf32, #tpu.memory_space<vmem>>, vector<2x1xf32>
    tpu.vector_store %arg13[%c0_67, %c0_68], %290 {strides = array<i32>} : memref<2x1xf32, #tpu.memory_space<vmem>>, vector<2x1xf32>,
    return
  }
  func.func @transform_0(%arg0: i32) -> (i32, i32) {
    %c0_i32 = arith.constant 0 : i32
    %c0_i32_0 = arith.constant 0 : i32
    %c0_i32_1 = arith.constant 0 : i32
    return %c0_i32, %c0_i32_0 : i32, i32
  }
  func.func @transform_1(%arg0: i32) -> (i32, i32) {
    %c0_i32 = arith.constant 0 : i32
    %c0_i32_0 = arith.constant 0 : i32
    %c0_i32_1 = arith.constant 0 : i32
    return %c0_i32, %c0_i32_0 : i32, i32
  }
  func.func @transform_2(%arg0: i32) -> (i32, i32) {
    %c0_i32 = arith.constant 0 : i32
    %c0_i32_0 = arith.constant 0 : i32
    %c0_i32_1 = arith.constant 0 : i32
    return %c0_i32, %c0_i32_0 : i32, i32
  }
  func.func @transform_3(%arg0: i32) -> (i32, i32) {
    %c0_i32 = arith.constant 0 : i32
    %c0_i32_0 = arith.constant 0 : i32
    %c0_i32_1 = arith.constant 0 : i32
    return %c0_i32, %c0_i32_0 : i32, i32
  }
  func.func @transform_4(%arg0: i32) -> (i32, i32) {
    %c0_i32 = arith.constant 0 : i32
    %c0_i32_0 = arith.constant 0 : i32
    %c0_i32_1 = arith.constant 0 : i32
    return %c0_i32, %c0_i32_0 : i32, i32
  }
  func.func @transform_5(%arg0: i32) -> (i32, i32) {
    %c0_i32 = arith.constant 0 : i32
    %c0_i32_0 = arith.constant 0 : i32
    %c0_i32_1 = arith.constant 0 : i32
    return %c0_i32, %c0_i32_0 : i32, i32
  }
  func.func @transform_6(%arg0: i32) -> (i32, i32) {
    %c0_i32 = arith.constant 0 : i32
    %c0_i32_0 = arith.constant 0 : i32
    %c0_i32_1 = arith.constant 0 : i32
    return %c0_i32, %c0_i32_0 : i32, i32
  }
  func.func @transform_7(%arg0: i32) -> (i32, i32) {
    %c0_i32 = arith.constant 0 : i32
    %c0_i32_0 = arith.constant 0 : i32
    %c0_i32_1 = arith.constant 0 : i32
    return %c0_i32, %c0_i32_0 : i32, i32
  }
  func.func @transform_8(%arg0: i32) -> (i32, i32) {
    %c0_i32 = arith.constant 0 : i32
    %c0_i32_0 = arith.constant 0 : i32
    %c0_i32_1 = arith.constant 0 : i32
    return %c0_i32, %c0_i32_0 : i32, i32
  }
  func.func @transform_9(%arg0: i32) -> (i32, i32) {
    %c0_i32 = arith.constant 0 : i32
    %c0_i32_0 = arith.constant 0 : i32
    %c0_i32_1 = arith.constant 0 : i32
    return %c0_i32, %c0_i32_0 : i32, i32
  }
  func.func @transform_10(%arg0: i32) -> (i32, i32) {
    %c0_i32 = arith.constant 0 : i32
    %c0_i32_0 = arith.constant 0 : i32
    %c0_i32_1 = arith.constant 0 : i32
    return %c0_i32, %c0_i32_0 : i32, i32
  }
  func.func @transform_11(%arg0: i32) -> (i32, i32) {
    %c0_i32 = arith.constant 0 : i32
    %c0_i32_0 = arith.constant 0 : i32
    %c0_i32_1 = arith.constant 0 : i32
    return %c0_i32, %c0_i32_0 : i32, i32
  }
  func.func @transform_12(%arg0: i32) -> (i32, i32) {
    %c0_i32 = arith.constant 0 : i32
    %c0_i32_0 = arith.constant 0 : i32
    %c0_i32_1 = arith.constant 0 : i32
    return %c0_i32, %c0_i32_0 : i32, i32
  }
}

</mosaic_0001>

<bundles_post_ra>
// kernel: tpu_custom_call.1
= control target key start
LH: loop header
LB: loop body
LE: loop exit
PB: predicated region body
PF: predicated region fallthrough
CT: control target
= control target key end

     0   :  { %s2737_s0 = inlined_call_operand.vmem [shape: f32[16,384], index: 0, kind: input, shape index: {}]   ;;  %s2738_s1 = inlined_call_operand.hbm [shape: f32[384,128], index: 1, kind: input, shape index: {}]   ;;  %s2739_s2 = inlined_call_operand.vmem [shape: f32[1,128], index: 2, kind: input, shape index: {}]   ;;  %s2740_s3 = inlined_call_operand.vmem [shape: f32[1,128], index: 3, kind: input, shape index: {}]   ;;  %s2741_s4 = inlined_call_operand.vmem [shape: f32[1,128], index: 4, kind: input, shape index: {}]   ;;  %s2742_s5 = inlined_call_operand.hbm [shape: f32[128,512], index: 5, kind: input, shape index: {}]   ;;  %s2743_s6 = inlined_call_operand.vmem [shape: f32[1,512], index: 6, kind: input, shape index: {}]   ;;  %s2744_s7 = inlined_call_operand.vmem [shape: f32[64,256], index: 7, kind: input, shape index: {}]   ;;  %s2745_s8 = inlined_call_operand.vmem [shape: f32[128,64], index: 8, kind: input, shape index: {}]   ;;  %s2746_s9 = inlined_call_operand.vmem [shape: f32[1,64], index: 9, kind: input, shape index: {}]   ;;  %s2747_s10 = inlined_call_operand.vmem [shape: f32[64,1], index: 10, kind: input, shape index: {}]   ;;  %s2748_s11 = inlined_call_operand.<no memory space> [shape: f32[1,1], index: 11, kind: input, shape index: {}]   ;;  %s2749_s12 = inlined_call_operand.vmem [shape: f32[2,1], index: 12, kind: output, shape index: {}]  }
   0x1   :  { %v17_v0 = vstv %s2748_s11 }
   0x2   :  { %18 = vst [vmem:[#allocation2] sm:$0x1] %v17_v0 }
   0x3   :  { %19 = vsyncpa [#allocation4], 0 }
   0x4   :  { %20 = vsyncpa [#allocation6], 0  ;;  %s2308_s23 = smov [#allocation3]   ;;  %s2260_s27 = scalar_lea.hbm %s2738_s1, 6144 }
   0x5   :  { %s28_s24 = sshll.u32 %s2308_s23, 4  ;;  %p2261_p0 = scmp.ne.s32.totalorder %s2738_s1, %s2260_s27  ;;  %s29_s24 = int_to_ptr.vmem [resolvable:$true] %s28_s24 }
   0x6   :  { %p2264_p1 = scmp.lt.u32.totalorder %s2260_s27, %s2738_s1 }
   0x8   :  { %p2266_p2 = pnand %p2264_p1, %p2261_p0 }
   0xa   :  { %2269 = shalt.err (!%p2266_p2)
}
   0xb   :  { %s2270_s11 = scalar_lea.vmem %s29_s24, 6144  ;;  %p2275_p4 = scmp.lt.s32.totalorder %s29_s24, %s29_s24 }
   0xc   :  { %p2271_p3 = scmp.ne.s32.totalorder %s29_s24, %s2270_s11  ;;  %p2276_p5 = scmp.lt.s32.totalorder %s2270_s11, %s2270_s11 }
   0xe   :  { %p2277_p6 = por %p2276_p5, %p2275_p4 }
  0x10   :  { %p2278_p7 = pnand %p2277_p6, %p2271_p3 }
  0x12   :  { %2281 = shalt.err (!%p2278_p7)
}
  0x13   :  { %s2309_s14 = smov 128   ;;  %s2310_s15 = smov 8  }
  0x14   :  { %34 = dma.hbm_to_vmem [thread:$0]  %s2738_s1, 6144, %s29_s24, [#allocation4], %s2309_s14, %s2309_s14, %s2310_s15  }
  0x15   :  { %s2311_s18 = smov [#allocation5]   ;;  %s2282_s22 = scalar_lea.hbm %s2742_s5, 8192 }
  0x16   :  { %s46_s19 = sshll.u32 %s2311_s18, 4  ;;  %p2283_p8 = scmp.ne.s32.totalorder %s2742_s5, %s2282_s22  ;;  %s47_s19 = int_to_ptr.vmem [resolvable:$true] %s46_s19 }
  0x17   :  { %p2286_p9 = scmp.lt.u32.totalorder %s2282_s22, %s2742_s5 }
  0x19   :  { %p2288_p10 = pnand %p2286_p9, %p2283_p8 }
  0x1b   :  { %2291 = shalt.err (!%p2288_p10)
}
  0x1c   :  { %s2292_s28 = scalar_lea.vmem %s47_s19, 8192  ;;  %p2297_p12 = scmp.lt.s32.totalorder %s47_s19, %s47_s19 }
  0x1d   :  { %p2293_p11 = scmp.ne.s32.totalorder %s47_s19, %s2292_s28  ;;  %p2298_p13 = scmp.lt.s32.totalorder %s2292_s28, %s2292_s28 }
  0x1f   :  { %p2299_p0 = por %p2298_p13, %p2297_p12 }
  0x21   :  { %p2300_p1 = pnand %p2299_p0, %p2293_p11 }
  0x23   :  { %2303 = shalt.err (!%p2300_p1)
}
  0x24   :  { %s2312_s1 = smov 512   ;;  %s2313_s24 = smov 32  }
  0x25   :  { %52 = dma.hbm_to_vmem [thread:$0]  %s2742_s5, 8192, %s47_s19, [#allocation6], %s2312_s1, %s2312_s1, %s2313_s24  }
  0x26   :  { %2304 = dma.done.wait [#allocation4], 6144  }
  0x27   :  { %2305 = vsyncadd [#allocation4], 4294961152 }
  0x28   :  { %2306 = dma.done.wait [#allocation6], 8192  }
  0x29   :  { %2307 = vsyncadd [#allocation6], 4294959104  ;;  %v93_v1 = vld [vmem:[#allocation3 + $0x80] sm:$0xff]  ;;  %v94_v2 = vld [vmem:[#allocation3 + $0x88] sm:$0xff]  ;;  %vm556_vm0 = vcmask 523264   ;;  %vm2317_vm1 = vmmov 0  }
  0x2a   :  { %v77_v3 = vld [vmem:[#allocation3] sm:$0xff]  ;;  %v1846_v4 = vpack.c.bf16 %v94_v2, %v93_v1  ;;  %v78_v5 = vld [vmem:[#allocation3 + $0x8] sm:$0xff]  ;;  %v95_v10 = vld [vmem:[#allocation3 + $0x90] sm:$0xff]  ;;  %vm1635_vm2 = vcmask 1024  }
  0x2b   :  { %v109_v6 = vld [vmem:[#allocation3 + $0x100] sm:$0xff]  ;;  %v110_v7 = vld [vmem:[#allocation3 + $0x108] sm:$0xff]  ;;  %v1848_v8 = vpack.c.bf16 %v78_v5, %v77_v3  ;;  %v96_v11 = vld [vmem:[#allocation3 + $0x98] sm:$0xff] }
  0x2c   :  { %v1878_v9 = vpack.c.bf16 %v110_v7, %v109_v6  ;;  %v79_v12 = vld [vmem:[#allocation3 + $0x10] sm:$0xff]  ;;  %1847 = vmatprep.subr.bf16.mxu0 %v1846_v4  ;;  %v1850_v13 = vpack.c.bf16 %v96_v11, %v95_v10  ;;  %v80_v14 = vld [vmem:[#allocation3 + $0x18] sm:$0xff]  ;;  %v97_v19 = vld [vmem:[#allocation3 + $0xa0] sm:$0xff] }
  0x2d   :  { %v111_v15 = vld [vmem:[#allocation3 + $0x110] sm:$0xff]  ;;  %v112_v16 = vld [vmem:[#allocation3 + $0x118] sm:$0xff]  ;;  %1849 = vmatpush3.bf16.msra.mxu0 %v1848_v8  ;;  %v1852_v17 = vpack.c.bf16 %v80_v14, %v79_v12  ;;  %v98_v20 = vld [vmem:[#allocation3 + $0xa8] sm:$0xff] }
  0x2e   :  { %1879 = vmatprep.subr.bf16.mxu1 %v1878_v9  ;;  %v1882_v18 = vpack.c.bf16 %v112_v16, %v111_v15  ;;  %v81_v21 = vld [vmem:[#allocation3 + $0x20] sm:$0xff]  ;;  %1851 = vmatprep.subr.bf16.mxu0 %v1850_v13  ;;  %v1854_v22 = vpack.c.bf16 %v98_v20, %v97_v19  ;;  %v82_v23 = vld [vmem:[#allocation3 + $0x28] sm:$0xff]  ;;  %v99_v27 = vld [vmem:[#allocation3 + $0xb0] sm:$0xff] }
  0x2f   :  { %1881 = vmatpush3.bf16.msra.mxu1 %v1878_v9  ;;  %v113_v24 = vld [vmem:[#allocation3 + $0x120] sm:$0xff]  ;;  %v114_v25 = vld [vmem:[#allocation3 + $0x128] sm:$0xff]  ;;  %v100_v28 = vld [vmem:[#allocation3 + $0xb8] sm:$0xff]  ;;  %v1856_v31 = vpack.c.bf16 %v82_v23, %v81_v21 }
  0x30   :  { %1883 = vmatprep.subr.bf16.mxu1 %v1882_v18  ;;  %v1886_v26 = vpack.c.bf16 %v114_v25, %v113_v24  ;;  %v115_v29 = vld [vmem:[#allocation3 + $0x130] sm:$0xff]  ;;  %v116_v30 = vld [vmem:[#allocation3 + $0x138] sm:$0xff]  ;;  %v1858_v32 = vpack.c.bf16 %v100_v28, %v99_v27  ;;  %v101_v36 = vld [vmem:[#allocation3 + $0xc0] sm:$0xff] }
  0x31   :  { %1853 = vmatpush3.bf16.msra.mxu0 %v1852_v17  ;;  %v83_v33 = vld [vmem:[#allocation3 + $0x30] sm:$0xff]  ;;  %v84_v34 = vld [vmem:[#allocation3 + $0x38] sm:$0xff]  ;;  %v1890_v35 = vpack.c.bf16 %v116_v30, %v115_v29  ;;  %v102_v37 = vld [vmem:[#allocation3 + $0xc8] sm:$0xff] }
  0x32   :  { %1855 = vmatprep.subr.bf16.mxu0 %v1854_v22  ;;  %v117_v38 = vld [vmem:[#allocation3 + $0x140] sm:$0xff]  ;;  %v118_v39 = vld [vmem:[#allocation3 + $0x148] sm:$0xff]  ;;  %v1860_v40 = vpack.c.bf16 %v84_v34, %v83_v33  ;;  %v1862_v41 = vpack.c.bf16 %v102_v37, %v101_v36  ;;  %v103_v45 = vld [vmem:[#allocation3 + $0xd0] sm:$0xff] }
  0x33   :  { %1885 = vmatpush3.bf16.msra.mxu1 %v1882_v18  ;;  %v85_v42 = vld [vmem:[#allocation3 + $0x40] sm:$0xff]  ;;  %v86_v43 = vld [vmem:[#allocation3 + $0x48] sm:$0xff]  ;;  %v1894_v44 = vpack.c.bf16 %v118_v39, %v117_v38  ;;  %v104_v46 = vld [vmem:[#allocation3 + $0xd8] sm:$0xff] }
  0x34   :  { %1887 = vmatprep.subr.bf16.mxu1 %v1886_v26  ;;  %v119_v47 = vld [vmem:[#allocation3 + $0x150] sm:$0xff]  ;;  %v120_v48 = vld [vmem:[#allocation3 + $0x158] sm:$0xff]  ;;  %v72_v49 = vld [vmem:[%s2737_s0 + $0x8] sm:$0xff]  ;;  %v1864_v50 = vpack.c.bf16 %v86_v43, %v85_v42  ;;  %v1866_v52 = vpack.c.bf16 %v104_v46, %v103_v45 }
  0x35   :  { %1857 = vmatpush3.bf16.msra.mxu0 %v1856_v31  ;;  %196 = vmatprep.mubr.f32.mxu0 %v72_v49  ;;  %v73_v51 = vld [vmem:[%s2737_s0 + $0x10] sm:$0xff]  ;;  %v88_v54 = vld [vmem:[#allocation3 + $0x58] sm:$0xff]  ;;  %v1898_v55 = vpack.c.bf16 %v120_v48, %v119_v47  ;;  %v105_v56 = vld [vmem:[#allocation3 + $0xe0] sm:$0xff] }
  0x36   :  { %1859 = vmatprep.subr.bf16.mxu0 %v1858_v32  ;;  %v87_v53 = vld [vmem:[#allocation3 + $0x50] sm:$0xff]  ;;  %v106_v57 = vld [vmem:[#allocation3 + $0xe8] sm:$0xff]  ;;  %1789 = vmatprep.mubr.f32.mxu1 %v73_v51  ;;  %v121_v58 = vld [vmem:[#allocation3 + $0x160] sm:$0xff] }
  0x37   :  { %1889 = vmatpush3.bf16.msra.mxu1 %v1886_v26  ;;  %v122_v59 = vld [vmem:[#allocation3 + $0x168] sm:$0xff]  ;;  %v1868_v60 = vpack.c.bf16 %v88_v54, %v87_v53  ;;  %v1870_v61 = vpack.c.bf16 %v106_v57, %v105_v56  ;;  %v89_v62 = vld [vmem:[#allocation3 + $0x60] sm:$0xff]  ;;  %v107_v1 = vld [vmem:[#allocation3 + $0xf0] sm:$0xff] }
  0x38   :  { %1891 = vmatprep.subr.bf16.mxu1 %v1890_v35  ;;  %v90_v63 = vld [vmem:[#allocation3 + $0x68] sm:$0xff]  ;;  %v1902_v0 = vpack.c.bf16 %v122_v59, %v121_v58  ;;  %v108_v2 = vld [vmem:[#allocation3 + $0xf8] sm:$0xff]  ;;  %v123_v3 = vld [vmem:[#allocation3 + $0x170] sm:$0xff] }
  0x39   :  { %1861 = vmatpush3.bf16.msra.mxu0 %v1860_v40  ;;  %v124_v4 = vld [vmem:[#allocation3 + $0x178] sm:$0xff]  ;;  %v1872_v5 = vpack.c.bf16 %v90_v63, %v89_v62  ;;  %v1874_v6 = vpack.c.bf16 %v108_v2, %v107_v1  ;;  %v91_v7 = vld [vmem:[#allocation3 + $0x70] sm:$0xff]  ;;  %v303_v10 = vld [vmem:[#allocation5 + $0x8] sm:$0xff] }
  0x3a   :  { %1863 = vmatprep.subr.bf16.mxu0 %v1862_v41  ;;  %v92_v8 = vld [vmem:[#allocation3 + $0x78] sm:$0xff]  ;;  %v1906_v9 = vpack.c.bf16 %v124_v4, %v123_v3  ;;  %v307_v11 = vld [vmem:[#allocation5 + $0x28] sm:$0xff]  ;;  %v302_v16 = vld [vmem:[#allocation5] sm:$0xff] }
  0x3b   :  { %1893 = vmatpush3.bf16.msra.mxu1 %v1890_v35  ;;  %v305_v12 = vld [vmem:[#allocation5 + $0x18] sm:$0xff]  ;;  %v1876_v14 = vpack.c.bf16 %v92_v8, %v91_v7  ;;  %v1910_v15 = vpack.c.bf16 %v307_v11, %v303_v10  ;;  %v306_v17 = vld [vmem:[#allocation5 + $0x20] sm:$0xff]  ;;  %v304_v19 = vld [vmem:[#allocation5 + $0x10] sm:$0xff] }
  0x3c   :  { %1895 = vmatprep.subr.bf16.mxu1 %v1894_v44  ;;  %v309_v13 = vld [vmem:[#allocation5 + $0x38] sm:$0xff]  ;;  %v308_v20 = vld [vmem:[#allocation5 + $0x30] sm:$0xff]  ;;  %v311_v21 = vld [vmem:[#allocation5 + $0x48] sm:$0xff]  ;;  %v1912_v28 = vpack.c.bf16 %v306_v17, %v302_v16 }
  0x3d   :  { %1865 = vmatpush3.bf16.msra.mxu0 %v1864_v50  ;;  %v1942_v18 = vpack.c.bf16 %v309_v13, %v305_v12  ;;  %v315_v22 = vld [vmem:[#allocation5 + $0x68] sm:$0xff]  ;;  %v313_v23 = vld [vmem:[#allocation5 + $0x58] sm:$0xff]  ;;  %v1944_v29 = vpack.c.bf16 %v308_v20, %v304_v19  ;;  %v310_v30 = vld [vmem:[#allocation5 + $0x40] sm:$0xff] }
  0x3e   :  { %1867 = vmatprep.subr.bf16.mxu0 %v1866_v52  ;;  %v317_v24 = vld [vmem:[#allocation5 + $0x78] sm:$0xff]  ;;  %v76_v27 = vld [vmem:[%s2737_s0 + $0x28] sm:$0xff]  ;;  %v1914_v32 = vpack.c.bf16 %v315_v22, %v311_v21  ;;  %v312_v34 = vld [vmem:[#allocation5 + $0x50] sm:$0xff] }
  0x3f   :  { %1897 = vmatpush3.bf16.msra.mxu1 %v1894_v44  ;;  %v71_v25 = vld [vmem:[%s2737_s0] sm:$0xff]  ;;  %v1946_v33 = vpack.c.bf16 %v317_v24, %v313_v23  ;;  %v316_v35 = vld [vmem:[#allocation5 + $0x70] sm:$0xff]  ;;  %v319_v36 = vld [vmem:[#allocation5 + $0x88] sm:$0xff] }
  0x40   :  { %1899 = vmatprep.subr.bf16.mxu1 %v1898_v55  ;;  %v75_v26 = vld [vmem:[%s2737_s0 + $0x20] sm:$0xff]  ;;  %v323_v37 = vld [vmem:[#allocation5 + $0xa8] sm:$0xff]  ;;  %v74_v40 = vld [vmem:[%s2737_s0 + $0x18] sm:$0xff]  ;;  %v1948_v42 = vpack.c.bf16 %v316_v35, %v312_v34 }
  0x41   :  { %1869 = vmatpush3.bf16.msra.mxu0 %v1868_v60  ;;  %v314_v31 = vld [vmem:[#allocation5 + $0x60] sm:$0xff]  ;;  %v321_v38 = vld [vmem:[#allocation5 + $0x98] sm:$0xff]  ;;  %v1918_v45 = vpack.c.bf16 %v323_v37, %v319_v36  ;;  %v320_v47 = vld [vmem:[#allocation5 + $0x90] sm:$0xff] }
  0x42   :  { %1871 = vmatprep.subr.bf16.mxu0 %v1870_v61  ;;  %v325_v39 = vld [vmem:[#allocation5 + $0xb8] sm:$0xff]  ;;  %v1916_v41 = vpack.c.bf16 %v314_v31, %v310_v30  ;;  %v318_v43 = vld [vmem:[#allocation5 + $0x80] sm:$0xff]  ;;  %v324_v48 = vld [vmem:[#allocation5 + $0xb0] sm:$0xff] }
  0x43   :  { %1901 = vmatpush3.bf16.msra.mxu1 %v1898_v55  ;;  %v322_v44 = vld [vmem:[#allocation5 + $0xa0] sm:$0xff]  ;;  %v1950_v46 = vpack.c.bf16 %v325_v39, %v321_v38  ;;  %v327_v49 = vld [vmem:[#allocation5 + $0xc8] sm:$0xff]  ;;  %v329_v51 = vld [vmem:[#allocation5 + $0xd8] sm:$0xff]  ;;  %v1952_v54 = vpack.c.bf16 %v324_v48, %v320_v47 }
  0x44   :  { %1903 = vmatprep.subr.bf16.mxu1 %v1902_v0  ;;  %v331_v50 = vld [vmem:[#allocation5 + $0xe8] sm:$0xff]  ;;  %v333_v52 = vld [vmem:[#allocation5 + $0xf8] sm:$0xff]  ;;  %v1920_v53 = vpack.c.bf16 %v322_v44, %v318_v43  ;;  %v326_v55 = vld [vmem:[#allocation5 + $0xc0] sm:$0xff] }
  0x45   :  { %1873 = vmatpush3.bf16.msra.mxu0 %v1872_v5  ;;  %v330_v56 = vld [vmem:[#allocation5 + $0xe0] sm:$0xff]  ;;  %v1922_v57 = vpack.c.bf16 %v331_v50, %v327_v49  ;;  %v1954_v58 = vpack.c.bf16 %v333_v52, %v329_v51  ;;  %v328_v59 = vld [vmem:[#allocation5 + $0xd0] sm:$0xff]  ;;  %v335_v61 = vld [vmem:[#allocation5 + $0x108] sm:$0xff]  ;;  %v2314_v50 = vmov 0.0  }
  0x46   :  { %1875 = vmatprep.subr.bf16.mxu0 %v1874_v6  ;;  %v332_v60 = vld [vmem:[#allocation5 + $0xf0] sm:$0xff]  ;;  %v339_v62 = vld [vmem:[#allocation5 + $0x128] sm:$0xff]  ;;  %v337_v63 = vld [vmem:[#allocation5 + $0x118] sm:$0xff]  ;;  %v1924_v1 = vpack.c.bf16 %v330_v56, %v326_v55 }
  0x47   :  { %1905 = vmatpush3.bf16.msra.mxu1 %v1902_v0  ;;  %v341_v0 = vld [vmem:[#allocation5 + $0x138] sm:$0xff]  ;;  %v1956_v2 = vpack.c.bf16 %v332_v60, %v328_v59  ;;  %v334_v3 = vld [vmem:[#allocation5 + $0x100] sm:$0xff]  ;;  %v1926_v4 = vpack.c.bf16 %v339_v62, %v335_v61  ;;  %v336_v7 = vld [vmem:[#allocation5 + $0x110] sm:$0xff] }
  0x48   :  { %1907 = vmatprep.subr.bf16.mxu1 %v1906_v9  ;;  %v338_v5 = vld [vmem:[#allocation5 + $0x120] sm:$0xff]  ;;  %v1958_v6 = vpack.c.bf16 %v341_v0, %v337_v63  ;;  %v340_v8 = vld [vmem:[#allocation5 + $0x130] sm:$0xff]  ;;  %v343_v11 = vld [vmem:[#allocation5 + $0x148] sm:$0xff] }
  0x49   :  { %1877 = vmatpush3.bf16.msra.mxu0 %v1876_v14  ;;  %v1960_v10 = vpack.c.bf16 %v340_v8, %v336_v7  ;;  %v347_v12 = vld [vmem:[#allocation5 + $0x168] sm:$0xff]  ;;  %v342_v14 = vld [vmem:[#allocation5 + $0x140] sm:$0xff]  ;;  %v345_v16 = vld [vmem:[#allocation5 + $0x158] sm:$0xff] }
  0x4a   :  { %1911 = vmatprep.subr.bf16.mxu0 %v1910_v15  ;;  %v1930_v13 = vpack.c.bf16 %v347_v12, %v343_v11  ;;  %v346_v15 = vld [vmem:[#allocation5 + $0x160] sm:$0xff]  ;;  %v344_v19 = vld [vmem:[#allocation5 + $0x150] sm:$0xff]  ;;  %v351_v23 = vld [vmem:[#allocation5 + $0x188] sm:$0xff] }
  0x4b   :  { %1909 = vmatpush3.bf16.msra.mxu1 %v1906_v9  ;;  %v1928_v9 = vpack.c.bf16 %v338_v5, %v334_v3  ;;  %v1932_v17 = vpack.c.bf16 %v346_v15, %v342_v14  ;;  %v348_v20 = vld [vmem:[#allocation5 + $0x170] sm:$0xff]  ;;  %v355_v24 = vld [vmem:[#allocation5 + $0x1a8] sm:$0xff]  ;;  %v357_v30 = vld [vmem:[#allocation5 + $0x1b8] sm:$0xff] }
  0x4c   :  { %1943 = vmatprep.subr.bf16.mxu1 %v1942_v18  ;;  %197 = vmatmul.mubr.f32.vlgmr.msra.gmra.mrb[0].mxu0 %v71_v25  ;;  %v349_v18 = vld [vmem:[#allocation5 + $0x178] sm:$0xff]  ;;  %v1964_v22 = vpack.c.bf16 %v348_v20, %v344_v19  ;;  %v1934_v25 = vpack.c.bf16 %v355_v24, %v351_v23  ;;  %v352_v31 = vld [vmem:[#allocation5 + $0x190] sm:$0xff]  ;;  %v359_v35 = vld [vmem:[#allocation5 + $0x1c8] sm:$0xff] }
  0x4d   :  { %201 = vmatprep.mubr.f32.mxu0 %v75_v26  ;;  %1913 = vmatpush1.bf16.msra.mxu0 %v1912_v28  ;;  %v1962_v21 = vpack.c.bf16 %v349_v18, %v345_v16  ;;  %v350_v26 = vld [vmem:[#allocation5 + $0x180] sm:$0xff]  ;;  %v363_v36 = vld [vmem:[#allocation5 + $0x1e8] sm:$0xff]  ;;  %v360_v43 = vld [vmem:[#allocation5 + $0x1d0] sm:$0xff] }
  0x4e   :  { %1790 = vmatmul.mubr.f32.vlgmr.msra.gmra.mrb[0].mxu1 %v76_v27  ;;  %1915 = vmatprep.subr.bf16.mxu0 %v1914_v32  ;;  %v354_v27 = vld [vmem:[#allocation5 + $0x1a0] sm:$0xff]  ;;  %v1938_v37 = vpack.c.bf16 %v363_v36, %v359_v35  ;;  %v543_v48 = vld [vmem:[%s2744_s7 + $0x18] sm:$0xff]  ;;  %v1644_v62 = vld [vmem:[%s2740_s3] ss:$0 sm:$0xff] }
  0x4f   :  { %1945 = vmatpush1.bf16.msra.mxu1 %v1944_v29  ;;  %v1936_v28 = vpack.c.bf16 %v354_v27, %v350_v26  ;;  %v353_v29 = vld [vmem:[#allocation5 + $0x198] sm:$0xff]  ;;  %v358_v38 = vld [vmem:[#allocation5 + $0x1c0] sm:$0xff]  ;;  %529 = vmatprep.mubr.f32.mxu1 %v2314_v50  ;;  %v554_v27 = vld [vmem:[%s2744_s7 + $0x70] sm:$0xff] }
  0x50   :  { %1947 = vmatprep.subr.bf16.mxu1 %v1946_v33  ;;  %202 = vmatmul.mubr.f32.gmra.mrb[2].mxu0 %v74_v40  ;;  %v1966_v32 = vpack.c.bf16 %v357_v30, %v353_v29  ;;  %v356_v33 = vld [vmem:[#allocation5 + $0x1b0] sm:$0xff]  ;;  %v362_v39 = vld [vmem:[#allocation5 + $0x1e0] sm:$0xff]  ;;  %v361_v40 = vld [vmem:[#allocation5 + $0x1d8] sm:$0xff]  ;;  %v368_v29 = vlaneseq }
  0x51   :  { %1917 = vmatpush1.bf16.msra.mxu0 %v1916_v41  ;;  %v1968_v34 = vpack.c.bf16 %v356_v33, %v352_v31  ;;  %v1940_v41 = vpack.c.bf16 %v362_v39, %v358_v38  ;;  %v541_v47 = vld [vmem:[%s2744_s7 + $0x8] sm:$0xff]  ;;  %452 = vmatprep.mubr.f32.mxu0 %v2314_v50  ;;  %v1645_v3 = vld [vmem:[%s2741_s4] ss:$0 sm:$0xff]  ;;  %v547_v5 = vld [vmem:[%s2744_s7 + $0x38] sm:$0xff] }
  0x52   :  { %1919 = vmatprep.subr.bf16.mxu0 %v1918_v45  ;;  %v364_v45 = vld [vmem:[#allocation5 + $0x1f0] sm:$0xff]  ;;  %v2434_v49 = vpack.c.bf16 %v543_v48, %v541_v47  ;;  %v544_v12 = vld [vmem:[%s2744_s7 + $0x20] sm:$0xff]  ;;  %v549_v14 = vld [vmem:[%s2744_s7 + $0x48] sm:$0xff]  ;;  %v369_v30 = vshrl.u32 %v368_v29, 7 }
  0x53   :  { %1949 = vmatpush1.bf16.msra.mxu1 %v1948_v42  ;;  %v365_v42 = vld [vmem:[#allocation5 + $0x1f8] sm:$0xff] }
  0x54   :  { %1951 = vmatprep.subr.bf16.mxu1 %v1950_v46  ;;  %v1970_v44 = vpack.c.bf16 %v365_v42, %v361_v40  ;;  %v1972_v46 = vpack.c.bf16 %v364_v45, %v360_v43  ;;  %v551_v15 = vld [vmem:[%s2744_s7 + $0x58] sm:$0xff]  ;;  %v548_v20 = vld [vmem:[%s2744_s7 + $0x40] sm:$0xff]  ;;  %v378_v31 = vsub.s32 2, %v369_v30  ;;  %v374_v36 = vsub.s32 1, %v369_v30 }
  0x55   :  { %1921 = vmatpush1.bf16.msra.mxu0 %v1920_v53  ;;  %v2483_v19 = vpack.c.bf16 %v551_v15, %v549_v14  ;;  %v555_v23 = vld [vmem:[%s2744_s7 + $0x78] sm:$0xff]  ;;  %v552_v26 = vld [vmem:[%s2744_s7 + $0x60] sm:$0xff] }
  0x56   :  { %1923 = vmatprep.subr.bf16.mxu0 %v1922_v57  ;;  %v366_v33 = vld [vmem:[%s2743_s6] sm:$0xf]  ;;  %s2315_s6 = smov 64  }
  0x57   :  { %1953 = vmatpush1.bf16.msra.mxu1 %v1952_v54  ;;  %v1643_v54 = vld [vmem:[%s2739_s2] ss:$0 sm:$0xff]  ;;  %v379_v39 = vrot.slane %v366_v33, %v378_v31 }
  0x58   :  { %1955 = vmatprep.subr.bf16.mxu1 %v1954_v58 }
  0x59   :  { %1925 = vmatpush1.bf16.msra.mxu0 %v1924_v1  ;;  %v540_v1 = vld [vmem:[%s2744_s7] sm:$0xff] }
  0x5a   :  { %1927 = vmatprep.subr.bf16.mxu0 %v1926_v4  ;;  %v545_v4 = vld [vmem:[%s2744_s7 + $0x28] sm:$0xff] }
  0x5b   :  { %1957 = vmatpush1.bf16.msra.mxu1 %v1956_v2  ;;  %v542_v2 = vld [vmem:[%s2744_s7 + $0x10] sm:$0xff]  ;;  %v2463_v11 = vpack.c.bf16 %v547_v5, %v545_v4 }
  0x5c   :  { %1959 = vmatprep.subr.bf16.mxu1 %v1958_v6  ;;  %v2461_v8 = vpack.c.bf16 %v542_v2, %v540_v1 }
  0x5d   :  { %1929 = vmatpush1.bf16.msra.mxu0 %v1928_v9 }
  0x5e   :  { %1931 = vmatprep.subr.bf16.mxu0 %v1930_v13  ;;  %v546_v13 = vld [vmem:[%s2744_s7 + $0x30] sm:$0xff] }
  0x5f   :  { %1961 = vmatpush1.bf16.msra.mxu1 %v1960_v10 }
  0x60   :  { %1963 = vmatprep.subr.bf16.mxu1 %v1962_v21  ;;  %v550_v21 = vld [vmem:[%s2744_s7 + $0x50] sm:$0xff] }
  0x61   :  { %1933 = vmatpush1.bf16.msra.mxu0 %v1932_v17  ;;  %v2479_v17 = vpack.c.bf16 %v546_v13, %v544_v12  ;;  %v2499_v24 = vpack.c.bf16 %v550_v21, %v548_v20 }
  0x62   :  { %1935 = vmatprep.subr.bf16.mxu0 %v1934_v25 }
  0x63   :  { %1965 = vmatpush1.bf16.msra.mxu1 %v1964_v22  ;;  %v553_v22 = vld [vmem:[%s2744_s7 + $0x68] sm:$0xff] }
  0x64   :  { %1967 = vmatprep.subr.bf16.mxu1 %v1966_v32  ;;  %v2503_v25 = vpack.c.bf16 %v555_v23, %v553_v22  ;;  %v370_v32 = vsub.s32 0, %v369_v30 }
  0x65   :  { %1937 = vmatpush1.bf16.msra.mxu0 %v1936_v28  ;;  %v2516_v28 = vpack.c.bf16 %v554_v27, %v552_v26 }
  0x66   :  { %1939 = vmatprep.subr.bf16.mxu0 %v1938_v37  ;;  %v371_v40 = vrot.slane %v366_v33, %v370_v32 }
  0x67   :  { %1969 = vmatpush1.bf16.msra.mxu1 %v1968_v34 }
  0x68   :  { %1971 = vmatprep.subr.bf16.mxu1 %v1970_v44 }
  0x69   :  { %1941 = vmatpush1.bf16.msra.mxu0 %v1940_v41  ;;  %v375_v41 = vrot.slane %v366_v33, %v374_v36 }
  0x6a   :  { %1975 = vmatprep.subr.bf16.mxu0 %v2434_v49 }
  0x6b   :  { %1973 = vmatpush1.bf16.msra.mxu1 %v1972_v46 }
  0x6c   :  { %1991 = vmatprep.subr.bf16.mxu1 %v2434_v49 }
 0x11f   :  { %v1707_v51 = vpop.f32.mrb[0].mxu0 }
 0x120   :  { %v1708_v52 = vpop.f32.mrb[1].mxu0 }
 0x121   :  { %v1791_v53 = vpop.f32.mrb[0].mxu1  ;;  %v1709_v55 = vadd.f32 %v1708_v52, %v1707_v51  ;;  %v382_v52 = vsub.s32 3, %v369_v30 }
 0x122   :  { %v273_v56 = vpop.f32.mrb[1].mxu1 }
 0x123   :  { %v1710_v57 = vpop.f32.mrb[2].mxu0  ;;  %v199_v58 = vadd.f32 %v1709_v55, %v1643_v54 }
 0x124   :  { %v1711_v59 = vpop.f32.mrb[3].mxu0 }
 0x125   :  { %v274_v60 = vadd.f32 %v273_v56, %v199_v58  ;;  %v1712_v61 = vadd.f32 %v1711_v59, %v1710_v57 }
 0x127   :  { %v282_v63 = vmax.f32 %v274_v60, 0.0  ;;  %v204_v0 = vadd.f32 %v1712_v61, %v1643_v54 }
 0x129   :  { %v291_v6 = vmul.f32 %v1644_v62, %v282_v63  ;;  %v279_v7 = vadd.f32 %v1791_v53, %v204_v0  ;;  %v383_v53 = vrot.slane %v366_v33, %v382_v52 }
 0x12b   :  { %v300_v9 = vadd.f32 %v1645_v3, %v291_v6  ;;  %v283_v10 = vmax.f32 %v279_v7, 0.0 }
 0x12d   :  { %453 = vmatmul.mubr.f32.vlgmr.msra.gmra.mrb[4].mxu0 %v300_v9  ;;  %530 = vmatmul.mubr.f32.vlgmr.msra.gmra.mrb[2].mxu1 %v300_v9  ;;  %v292_v16 = vmul.f32 %v1644_v62, %v283_v10 }
 0x12e   :  { %1977 = vmatpush1.bf16.msra.mxu0 %v2461_v8  ;;  %458 = vmatprep.mubr.f32.mxu0 %v2314_v50 }
 0x12f   :  { %533 = vmatprep.mubr.f32.mxu1 %v2314_v50  ;;  %1979 = vmatprep.subr.bf16.mxu0 %v2463_v11  ;;  %v301_v18 = vadd.f32 %v1645_v3, %v292_v16 }
 0x130   :  { %1993 = vmatpush1.bf16.msra.mxu1 %v2461_v8 }
 0x131   :  { %459 = vmatmul.mubr.f32.gmra.mrb[6].mxu0 %v301_v18  ;;  %534 = vmatmul.mubr.f32.gmra.mrb[4].mxu1 %v301_v18 }
 0x132   :  { %1981 = vmatpush1.bf16.msra.mxu0 %v2479_v17  ;;  %624 = vmatprep.mubr.f32.mxu0 %v2314_v50 }
 0x133   :  { %1983 = vmatprep.subr.bf16.mxu0 %v2483_v19  ;;  %1995 = vmatprep.subr.bf16.mxu1 %v2463_v11 }
 0x134   :  { %1997 = vmatpush1.bf16.msra.mxu1 %v2479_v17  ;;  %724 = vmatprep.mubr.f32.mxu1 %v2314_v50 }
 0x135   :  { %1999 = vmatprep.subr.bf16.mxu1 %v2483_v19 }
 0x136   :  { %1985 = vmatpush1.bf16.msra.mxu0 %v2499_v24 }
 0x137   :  { %1987 = vmatprep.subr.bf16.mxu0 %v2503_v25 }
 0x138   :  { %2001 = vmatpush1.bf16.msra.mxu1 %v2499_v24 }
 0x139   :  { %2003 = vmatprep.subr.bf16.mxu1 %v2503_v25 }
 0x13a   :  { %1989 = vmatpush1.bf16.msra.mxu0 %v2516_v28 }
 0x13b   :  { %2007 = vmatprep.subr.bf16.mxu0 %v2434_v49 }
 0x13c   :  { %2005 = vmatpush1.bf16.msra.mxu1 %v2516_v28 }
 0x13d   :  { %625 = vmatmul.mubr.f32.vlgmr.msra.gmra.mrb[8].mxu0 %v2314_v50  ;;  %2023 = vmatprep.subr.bf16.mxu1 %v2434_v49 }
 0x13e   :  { %2009 = vmatpush1.bf16.msra.mxu0 %v2461_v8  ;;  %834 = vmatprep.mubr.f32.mxu0 %v2314_v50 }
 0x13f   :  { %2011 = vmatprep.subr.bf16.mxu0 %v2463_v11 }
 0x142   :  { %2013 = vmatpush1.bf16.msra.mxu0 %v2479_v17 }
 0x143   :  { %2015 = vmatprep.subr.bf16.mxu0 %v2483_v19 }
 0x146   :  { %2017 = vmatpush1.bf16.msra.mxu0 %v2499_v24 }
 0x147   :  { %2019 = vmatprep.subr.bf16.mxu0 %v2503_v25 }
 0x14a   :  { %2021 = vmatpush1.bf16.msra.mxu0 %v2516_v28 }
 0x14b   :  { %2039 = vmatprep.subr.bf16.mxu0 %v2434_v49 }
 0x200   :  { %v454_v34 = vpop.f32.mrb[4].mxu0  ;;  %v531_v35 = vpop.f32.mrb[2].mxu1 }
 0x201   :  { %v456_v37 = vpop.f32.mrb[5].mxu0  ;;  %v532_v38 = vpop.f32.mrb[3].mxu1  ;;  %v2542_v54 = vadd.f32 %v454_v34, %v371_v40 }
 0x202   :  { %v2548_v62 = vadd.f32 %v456_v37, %v375_v41 }
 0x204   :  { %v460_v42 = vpop.f32.mrb[6].mxu0  ;;  %v535_v43 = vpop.f32.mrb[4].mxu1 }
 0x205   :  { %v2538_v44 = vadd.f32 %v460_v42, %v371_v40  ;;  %v536_v45 = vadd.f32 %v535_v43, %v379_v39  ;;  %v462_v46 = vpop.f32.mrb[7].mxu0  ;;  %v537_v47 = vpop.f32.mrb[5].mxu1 }
 0x206   :  { %v2540_v48 = vadd.f32 %v462_v46, %v375_v41  ;;  %v2544_v55 = vadd.f32 %v537_v47, %v383_v53 }
 0x207   :  { %v1669_v51 = vmul.f32 -1.442695, %v536_v45 }
 0x209   :  { %2148 = vpow2.f32 %v1669_v51 }
 0x20a   :  { %2150 = vtanh.f32 %v2544_v55 }
 0x210   :  { %v626_v56 = vpop.f32.mrb[8].mxu0 }
 0x211   :  { %v631_v57 = vadd.f32 %v626_v56, %v2542_v54  ;;  %v628_v58 = vpop.f32.mrb[9].mxu0 }
 0x212   :  { %v632_v63 = vadd.f32 %v628_v58, %v2548_v62 }
 0x213   :  { %v2149_v59 = vpop.eup %2148  ;;  %v1646_v60 = vmul.f32 -1.442695, %v631_v57 }
 0x214   :  { %v1420_v61 = vadd.f32 1.0, %v2149_v59  ;;  %v2151_v0 = vpop.eup %2150  ;;  %v1647_v9 = vmul.f32 -1.442695, %v632_v63 }
 0x215   :  { %2152 = vpow2.f32 %v1646_v60 }
 0x216   :  { %2154 = vrcp.f32 %v1420_v61 }
 0x217   :  { %2156 = vtanh.f32 %v632_v63 }
 0x21f   :  { %v2153_v1 = vpop.eup %2152 }
 0x220   :  { %v2551_v2 = vpop.eup %2154  ;;  %v636_v3 = vadd.f32 1.0, %v2153_v1 }
 0x221   :  { %v2554_v4 = vmul.f32 %v2551_v2, %v2151_v0  ;;  %v2157_v5 = vpop.eup %2156 }
 0x222   :  { %2158 = vrcp.f32 %v636_v3 }
 0x223   :  { %2160 = vpow2.f32 %v1647_v9 }
 0x22c   :  { %v2159_v6 = vpop.eup %2158 }
 0x22d   :  { %v647_v7 = vmul.f32 %v2159_v6, %v2157_v5  ;;  %v2161_v10 = vpop.eup %2160  ;;  %v646_v13 = vmul.f32 0.0, %v2159_v6 }
 0x22e   :  { %v643_v12 = vadd.f32 1.0, %v2161_v10 }
 0x22f   :  { %649 = vrot.lane.b32.xlu0 %v647_v7, %s2315_s6 }
 0x230   :  { %2162 = vrcp.f32 %v643_v12 }
 0x23a   :  { %v2163_v16 = vpop.eup %2162 }
 0x2a1   :  { %v650_v14 = vpop.permute.xlu0 %649 }
 0x2a2   :  { %v652_v15 = vadd.f32 %v650_v14, %v646_v13 }
 0x2a4   :  { %2164 = vtanh.f32 %v652_v15  ;;  %v753_v35 = vrot.slane %v652_v15, 6 }
 0x2ae   :  { %v2165_v18 = vpop.eup %2164 }
 0x2af   :  { %v654_v20 = vmul.f32 %v2165_v18, %v2163_v16 }
 0x2b1   :  { %656 = vrot.lane.b32.xlu0 %v654_v20, %s2315_s6 }
 0x323   :  { %v657_v21 = vpop.permute.xlu0 %656 }
 0x324   :  { %1648 = vmatmul.mubr.msk.f32.vlgmr.msra.gmra.mrb[6].mxu1 %vm556_vm0, %v657_v21 }
 0x325   :  { %2025 = vmatpush1.bf16.msra.mxu1 %v2461_v8  ;;  %944 = vmatprep.mubr.f32.mxu1 %v2314_v50 }
 0x326   :  { %2027 = vmatprep.subr.bf16.mxu1 %v2463_v11 }
 0x329   :  { %2029 = vmatpush1.bf16.msra.mxu1 %v2479_v17 }
 0x32a   :  { %2031 = vmatprep.subr.bf16.mxu1 %v2483_v19 }
 0x32d   :  { %2033 = vmatpush1.bf16.msra.mxu1 %v2499_v24 }
 0x32e   :  { %2035 = vmatprep.subr.bf16.mxu1 %v2503_v25 }
 0x331   :  { %2037 = vmatpush1.bf16.msra.mxu1 %v2516_v28 }
 0x332   :  { %2055 = vmatprep.subr.bf16.mxu1 %v2434_v49 }
 0x3f7   :  { %v726_v22 = vpop.f32.mrb[6].mxu1 }
 0x3f8   :  { %v733_v23 = vrot.slane %v726_v22, 6  ;;  %v728_v26 = vpop.f32.mrb[7].mxu1 }
 0x3f9   :  { %v734_v30 = vrot.slane %v728_v26, 6 }
 0x3fa   :  { %v737_v27 = vadd.f32 %v733_v23, %v2542_v54 }
 0x3fb   :  { %v738_v31 = vadd.f32 %v734_v30, %v2548_v62 }
 0x3fc   :  { %v1649_v29 = vmul.f32 -1.442695, %v737_v27 }
 0x3fd   :  { %v1650_v39 = vmul.f32 -1.442695, %v738_v31 }
 0x3fe   :  { %2166 = vpow2.f32 %v1649_v29 }
 0x3ff   :  { %2168 = vtanh.f32 %v738_v31 }
 0x408   :  { %v2167_v32 = vpop.eup %2166 }
 0x409   :  { %v742_v33 = vadd.f32 1.0, %v2167_v32  ;;  %v2169_v34 = vpop.eup %2168 }
 0x40b   :  { %2170 = vrcp.f32 %v742_v33 }
 0x40c   :  { %2172 = vpow2.f32 %v1650_v39 }
 0x415   :  { %v2171_v36 = vpop.eup %2170 }
 0x416   :  { %v756_v37 = vmul.f32 %v2171_v36, %v2169_v34  ;;  %v755_v38 = vmul.f32 %v2171_v36, %v753_v35  ;;  %v2173_v40 = vpop.eup %2172 }
 0x417   :  { %v749_v41 = vadd.f32 1.0, %v2173_v40 }
 0x418   :  { %758 = vrot.lane.b32.xlu1 %v756_v37, %s2315_s6 }
 0x419   :  { %2174 = vrcp.f32 %v749_v41 }
 0x423   :  { %v2175_v45 = vpop.eup %2174 }
 0x48a   :  { %v759_v42 = vpop.permute.xlu1 %758 }
 0x48b   :  { %v761_v43 = vadd.f32 %v759_v42, %v755_v38 }
 0x48d   :  { %2176 = vtanh.f32 %v761_v43  ;;  %v863_v3 = vrot.slane %v761_v43, 6 }
 0x497   :  { %v2177_v46 = vpop.eup %2176 }
 0x498   :  { %v763_v47 = vmul.f32 %v2177_v46, %v2175_v45 }
 0x49a   :  { %v765_v51 = vrot.slane %v763_v47, 2 }
 0x49c   :  { %766 = vrot.lane.b32.xlu1 %v765_v51, %s2315_s6 }
 0x50e   :  { %v767_v52 = vpop.permute.xlu1 %766 }
 0x50f   :  { %1651 = vmatmul.mubr.msk.f32.vlgmr.msra.gmra.mrb[10].mxu0 %vm556_vm0, %v767_v52 }
 0x510   :  { %2041 = vmatpush1.bf16.msra.mxu0 %v2461_v8  ;;  %1054 = vmatprep.mubr.f32.mxu0 %v2314_v50 }
 0x511   :  { %2043 = vmatprep.subr.bf16.mxu0 %v2463_v11 }
 0x514   :  { %2045 = vmatpush1.bf16.msra.mxu0 %v2479_v17 }
 0x515   :  { %2047 = vmatprep.subr.bf16.mxu0 %v2483_v19 }
 0x518   :  { %2049 = vmatpush1.bf16.msra.mxu0 %v2499_v24 }
 0x519   :  { %2051 = vmatprep.subr.bf16.mxu0 %v2503_v25 }
 0x51c   :  { %2053 = vmatpush1.bf16.msra.mxu0 %v2516_v28 }
 0x51d   :  { %2071 = vmatprep.subr.bf16.mxu0 %v2434_v49 }
 0x5e2   :  { %v836_v53 = vpop.f32.mrb[10].mxu0 }
 0x5e3   :  { %v843_v56 = vrot.slane %v836_v53, 4  ;;  %v838_v57 = vpop.f32.mrb[11].mxu0 }
 0x5e4   :  { %v844_v60 = vrot.slane %v838_v57, 4 }
 0x5e5   :  { %v847_v58 = vadd.f32 %v843_v56, %v2542_v54 }
 0x5e6   :  { %v848_v61 = vadd.f32 %v844_v60, %v2548_v62 }
 0x5e7   :  { %v1652_v59 = vmul.f32 -1.442695, %v847_v58 }
 0x5e8   :  { %v1653_v9 = vmul.f32 -1.442695, %v848_v61 }
 0x5e9   :  { %2178 = vpow2.f32 %v1652_v59 }
 0x5ea   :  { %2180 = vtanh.f32 %v848_v61 }
 0x5f3   :  { %v2179_v63 = vpop.eup %2178 }
 0x5f4   :  { %v852_v0 = vadd.f32 1.0, %v2179_v63  ;;  %v2181_v1 = vpop.eup %2180 }
 0x5f6   :  { %2182 = vrcp.f32 %v852_v0 }
 0x5f7   :  { %2184 = vpow2.f32 %v1653_v9 }
 0x600   :  { %v2183_v5 = vpop.eup %2182 }
 0x601   :  { %v866_v6 = vmul.f32 %v2183_v5, %v2181_v1  ;;  %v865_v7 = vmul.f32 %v2183_v5, %v863_v3  ;;  %v2185_v10 = vpop.eup %2184 }
 0x602   :  { %v859_v12 = vadd.f32 1.0, %v2185_v10 }
 0x603   :  { %868 = vrot.lane.b32.xlu0 %v866_v6, %s2315_s6 }
 0x604   :  { %2186 = vrcp.f32 %v859_v12 }
 0x60e   :  { %v2187_v15 = vpop.eup %2186 }
 0x675   :  { %v869_v13 = vpop.permute.xlu0 %868 }
 0x676   :  { %v871_v14 = vadd.f32 %v869_v13, %v865_v7 }
 0x678   :  { %2188 = vtanh.f32 %v871_v14  ;;  %v973_v35 = vrot.slane %v871_v14, 6 }
 0x682   :  { %v2189_v16 = vpop.eup %2188 }
 0x683   :  { %v873_v18 = vmul.f32 %v2189_v16, %v2187_v15 }
 0x685   :  { %v875_v20 = vrot.slane %v873_v18, 4 }
 0x687   :  { %876 = vrot.lane.b32.xlu1 %v875_v20, %s2315_s6 }
 0x6f9   :  { %v877_v21 = vpop.permute.xlu1 %876 }
 0x6fa   :  { %1654 = vmatmul.mubr.msk.f32.vlgmr.msra.gmra.mrb[8].mxu1 %vm556_vm0, %v877_v21 }
 0x6fb   :  { %2057 = vmatpush1.bf16.msra.mxu1 %v2461_v8  ;;  %1157 = vmatprep.mubr.f32.mxu1 %v2314_v50 }
 0x6fc   :  { %2059 = vmatprep.subr.bf16.mxu1 %v2463_v11 }
 0x6ff   :  { %2061 = vmatpush1.bf16.msra.mxu1 %v2479_v17 }
 0x700   :  { %2063 = vmatprep.subr.bf16.mxu1 %v2483_v19 }
 0x703   :  { %2065 = vmatpush1.bf16.msra.mxu1 %v2499_v24 }
 0x704   :  { %2067 = vmatprep.subr.bf16.mxu1 %v2503_v25 }
 0x707   :  { %2069 = vmatpush1.bf16.msra.mxu1 %v2516_v28 }
 0x708   :  { %2087 = vmatprep.subr.bf16.mxu1 %v2434_v49 }
 0x7cd   :  { %v946_v22 = vpop.f32.mrb[8].mxu1 }
 0x7ce   :  { %v953_v23 = vrot.slane %v946_v22, 2  ;;  %v948_v26 = vpop.f32.mrb[9].mxu1 }
 0x7cf   :  { %v954_v30 = vrot.slane %v948_v26, 2 }
 0x7d0   :  { %v957_v27 = vadd.f32 %v953_v23, %v2542_v54 }
 0x7d1   :  { %v958_v31 = vadd.f32 %v954_v30, %v2548_v62 }
 0x7d2   :  { %v1655_v29 = vmul.f32 -1.442695, %v957_v27 }
 0x7d3   :  { %v1656_v49 = vmul.f32 -1.442695, %v958_v31 }
 0x7d4   :  { %2190 = vpow2.f32 %v1655_v29 }
 0x7d5   :  { %2192 = vtanh.f32 %v958_v31 }
 0x7de   :  { %v2191_v32 = vpop.eup %2190 }
 0x7df   :  { %v962_v33 = vadd.f32 1.0, %v2191_v32  ;;  %v2193_v34 = vpop.eup %2192 }
 0x7e1   :  { %2194 = vrcp.f32 %v962_v33 }
 0x7e2   :  { %2196 = vpow2.f32 %v1656_v49 }
 0x7eb   :  { %v2195_v36 = vpop.eup %2194 }
 0x7ec   :  { %v976_v37 = vmul.f32 %v2195_v36, %v2193_v34  ;;  %v975_v38 = vmul.f32 %v2195_v36, %v973_v35  ;;  %v2197_v39 = vpop.eup %2196 }
 0x7ed   :  { %v969_v54 = vadd.f32 1.0, %v2197_v39 }
 0x7ee   :  { %978 = vrot.lane.b32.xlu0 %v976_v37, %s2315_s6 }
 0x7ef   :  { %2198 = vrcp.f32 %v969_v54 }
 0x7f9   :  { %v2199_v62 = vpop.eup %2198 }
 0x860   :  { %v979_v40 = vpop.permute.xlu0 %978 }
 0x861   :  { %v981_v41 = vadd.f32 %v979_v40, %v975_v38 }
 0x863   :  { %2200 = vtanh.f32 %v981_v41  ;;  %v1077_v60 = vrot.slane %v981_v41, 6 }
 0x86d   :  { %v2201_v42 = vpop.eup %2200 }
 0x86e   :  { %v983_v43 = vmul.f32 %v2201_v42, %v2199_v62 }
 0x870   :  { %v985_v45 = vrot.slane %v983_v43, 6 }
 0x872   :  { %986 = vrot.lane.b32.xlu1 %v985_v45, %s2315_s6 }
 0x8e4   :  { %v987_v46 = vpop.permute.xlu1 %986 }
 0x8e5   :  { %1657 = vmatmul.mubr.msk.f32.vlgmr.msra.gmra.mrb[12].mxu0 %vm556_vm0, %v987_v46 }
 0x8e6   :  { %2073 = vmatpush1.bf16.msra.mxu0 %v2461_v8  ;;  %1267 = vmatprep.mubr.f32.mxu0 %v2314_v50 }
 0x8e7   :  { %2075 = vmatprep.subr.bf16.mxu0 %v2463_v11 }
 0x8ea   :  { %2077 = vmatpush1.bf16.msra.mxu0 %v2479_v17 }
 0x8eb   :  { %2079 = vmatprep.subr.bf16.mxu0 %v2483_v19 }
 0x8ee   :  { %2081 = vmatpush1.bf16.msra.mxu0 %v2499_v24 }
 0x8ef   :  { %2083 = vmatprep.subr.bf16.mxu0 %v2503_v25 }
 0x8f2   :  { %2085 = vmatpush1.bf16.msra.mxu0 %v2516_v28 }
 0x9b8   :  { %v1056_v47 = vpop.f32.mrb[12].mxu0 }
 0x9b9   :  { %v1061_v51 = vadd.f32 %v1056_v47, %v2538_v44  ;;  %v1058_v52 = vpop.f32.mrb[13].mxu0 }
 0x9ba   :  { %v1062_v56 = vadd.f32 %v1058_v52, %v2540_v48 }
 0x9bb   :  { %v1658_v53 = vmul.f32 -1.442695, %v1061_v51 }
 0x9bc   :  { %v1659_v1 = vmul.f32 -1.442695, %v1062_v56 }
 0x9bd   :  { %2202 = vpow2.f32 %v1658_v53 }
 0x9be   :  { %2204 = vtanh.f32 %v1062_v56 }
 0x9c7   :  { %v2203_v57 = vpop.eup %2202 }
 0x9c8   :  { %v1066_v58 = vadd.f32 1.0, %v2203_v57  ;;  %v2205_v59 = vpop.eup %2204 }
 0x9ca   :  { %2206 = vrcp.f32 %v1066_v58 }
 0x9cb   :  { %2208 = vpow2.f32 %v1659_v1 }
 0x9d4   :  { %v2207_v61 = vpop.eup %2206 }
 0x9d5   :  { %v1080_v63 = vmul.f32 %v2207_v61, %v2205_v59  ;;  %v1079_v0 = vmul.f32 %v2207_v61, %v1077_v60  ;;  %v2209_v3 = vpop.eup %2208 }
 0x9d6   :  { %v1073_v5 = vadd.f32 1.0, %v2209_v3 }
 0x9d7   :  { %1082 = vrot.lane.b32.xlu0 %v1080_v63, %s2315_s6  ;;  %v1670_v63 = vmul.f32 -1.442695, %v2544_v55 }
 0x9d8   :  { %2210 = vrcp.f32 %v1073_v5  ;;  %v1430_v5 = vmul.f32 0.0, %v2551_v2 }
 0x9e2   :  { %v2211_v9 = vpop.eup %2210 }
 0xa49   :  { %v1083_v6 = vpop.permute.xlu0 %1082 }
 0xa4a   :  { %v1085_v7 = vadd.f32 %v1083_v6, %v1079_v0 }
 0xa4c   :  { %2212 = vtanh.f32 %v1085_v7 }
 0xa56   :  { %v2213_v10 = vpop.eup %2212 }
 0xa57   :  { %v1087_v12 = vmul.f32 %v2213_v10, %v2211_v9 }
 0xa59   :  { %1089 = vrot.lane.b32.xlu1 %v1087_v12, %s2315_s6 }
 0xacb   :  { %v1090_v13 = vpop.permute.xlu1 %1089 }
 0xacc   :  { %1660 = vmatmul.mubr.msk.f32.vlgmr.msra.gmra.mrb[10].mxu1 %vm556_vm0, %v1090_v13 }
 0xacd   :  { %2089 = vmatpush1.bf16.msra.mxu1 %v2461_v8  ;;  %1377 = vmatprep.mubr.f32.mxu1 %v2314_v50 }
 0xace   :  { %2091 = vmatprep.subr.bf16.mxu1 %v2463_v11 }
 0xad1   :  { %2093 = vmatpush1.bf16.msra.mxu1 %v2479_v17 }
 0xad2   :  { %2095 = vmatprep.subr.bf16.mxu1 %v2483_v19 }
 0xad5   :  { %2097 = vmatpush1.bf16.msra.mxu1 %v2499_v24  ;;  %v1186_v24 = vrot.slane %v1085_v7, 6 }
 0xad6   :  { %2099 = vmatprep.subr.bf16.mxu1 %v2503_v25 }
 0xad9   :  { %2101 = vmatpush1.bf16.msra.mxu1 %v2516_v28 }
 0xb9f   :  { %v1159_v14 = vpop.f32.mrb[10].mxu1 }
 0xba0   :  { %v1166_v15 = vrot.slane %v1159_v14, 6  ;;  %v1161_v16 = vpop.f32.mrb[11].mxu1 }
 0xba1   :  { %v1167_v20 = vrot.slane %v1161_v16, 6 }
 0xba2   :  { %v1170_v18 = vadd.f32 %v1166_v15, %v2538_v44 }
 0xba3   :  { %v1171_v11 = vadd.f32 %v1167_v20, %v2540_v48 }
 0xba4   :  { %v1661_v8 = vmul.f32 -1.442695, %v1170_v18 }
 0xba5   :  { %v1662_v28 = vmul.f32 -1.442695, %v1171_v11 }
 0xba6   :  { %2214 = vpow2.f32 %v1661_v8 }
 0xba7   :  { %2216 = vtanh.f32 %v1171_v11 }
 0xbb0   :  { %v2215_v21 = vpop.eup %2214 }
 0xbb1   :  { %v1175_v17 = vadd.f32 1.0, %v2215_v21  ;;  %v2217_v19 = vpop.eup %2216 }
 0xbb3   :  { %2218 = vrcp.f32 %v1175_v17 }
 0xbb4   :  { %2220 = vpow2.f32 %v1662_v28 }
 0xbbd   :  { %v2219_v22 = vpop.eup %2218 }
 0xbbe   :  { %v1189_v25 = vmul.f32 %v2219_v22, %v2217_v19  ;;  %v1188_v23 = vmul.f32 %v2219_v22, %v1186_v24  ;;  %v2221_v26 = vpop.eup %2220  ;;  %v1445_v24 = vld [vmem:[%s2745_s8 + $0x8] sm:$0xff]  ;;  %v2316_v22 = vmov 0.0|0.0  }
 0xbbf   :  { %v1182_v27 = vadd.f32 1.0, %v2221_v26  ;;  %2102 = vmatprep.subr.bf16.mxu0 %v2316_v22  ;;  %2126 = vmatprep.subr.bf16.mxu1 %v2316_v22  ;;  %v1448_v26 = vld [vmem:[%s2745_s8 + $0x20] sm:$0xff] }
 0xbc0   :  { %1191 = vrot.lane.b32.xlu0 %v1189_v25, %s2315_s6 }
 0xbc1   :  { %2222 = vrcp.f32 %v1182_v27  ;;  %v1449_v27 = vld [vmem:[%s2745_s8 + $0x28] sm:$0xff] }
 0xbcb   :  { %v2223_v31 = vpop.eup %2222 }
 0xc32   :  { %v1192_v29 = vpop.permute.xlu0 %1191 }
 0xc33   :  { %v1194_v30 = vadd.f32 %v1192_v29, %v1188_v23  ;;  %v1447_v23 = vld [vmem:[%s2745_s8 + $0x18] sm:$0xff]  ;;  %v2109_v29 = vpack.c.bf16 %v1449_v27, %v1448_v26 }
 0xc35   :  { %2224 = vtanh.f32 %v1194_v30  ;;  %v1296_v43 = vrot.slane %v1194_v30, 6  ;;  %v1450_v30 = vld [vmem:[%s2745_s8 + $0x30] sm:$0xff] }
 0xc3f   :  { %v2225_v32 = vpop.eup %2224 }
 0xc40   :  { %v1196_v33 = vmul.f32 %v2225_v32, %v2223_v31  ;;  %v1451_v31 = vld [vmem:[%s2745_s8 + $0x38] sm:$0xff] }
 0xc41   :  { %v2112_v32 = vpack.c.bf16 %v1451_v31, %v1450_v30 }
 0xc42   :  { %v1198_v34 = vrot.slane %v1196_v33, 2  ;;  %v1452_v33 = vld [vmem:[%s2745_s8 + $0x40] sm:$0xff] }
 0xc44   :  { %1199 = vrot.lane.b32.xlu1 %v1198_v34, %s2315_s6  ;;  %v1453_v34 = vld [vmem:[%s2745_s8 + $0x48] sm:$0xff] }
 0xcb6   :  { %v1200_v35 = vpop.permute.xlu1 %1199 }
 0xcb7   :  { %1663 = vmatmul.mubr.msk.f32.vlgmr.msra.gmra.mrb[14].mxu0 %vm556_vm0, %v1200_v35  ;;  %v2115_v35 = vpack.c.bf16 %v1453_v34, %v1452_v33 }
 0xcb8   :  { %1824 = vmatprep.mubr.msk.f32.mxu0 %vm2317_vm1, %v2314_v50 }
 0xd8a   :  { %v1269_v36 = vpop.f32.mrb[14].mxu0 }
 0xd8b   :  { %v1276_v37 = vrot.slane %v1269_v36, 4  ;;  %v1271_v38 = vpop.f32.mrb[15].mxu0  ;;  %v1454_v36 = vld [vmem:[%s2745_s8 + $0x50] sm:$0xff] }
 0xd8c   :  { %v1277_v54 = vrot.slane %v1271_v38, 4 }
 0xd8d   :  { %v1280_v49 = vadd.f32 %v1276_v37, %v2538_v44  ;;  %v1455_v37 = vld [vmem:[%s2745_s8 + $0x58] sm:$0xff] }
 0xd8e   :  { %v1281_v40 = vadd.f32 %v1277_v54, %v2540_v48  ;;  %v2118_v38 = vpack.c.bf16 %v1455_v37, %v1454_v36 }
 0xd8f   :  { %v1664_v39 = vmul.f32 -1.442695, %v1280_v49  ;;  %v1456_v49 = vld [vmem:[%s2745_s8 + $0x60] sm:$0xff] }
 0xd90   :  { %v1665_v51 = vmul.f32 -1.442695, %v1281_v40 }
 0xd91   :  { %2226 = vpow2.f32 %v1664_v39  ;;  %v1457_v39 = vld [vmem:[%s2745_s8 + $0x68] sm:$0xff] }
 0xd92   :  { %2228 = vtanh.f32 %v1281_v40  ;;  %v2121_v54 = vpack.c.bf16 %v1457_v39, %v1456_v49 }
 0xd9b   :  { %v2227_v41 = vpop.eup %2226 }
 0xd9c   :  { %v1285_v62 = vadd.f32 1.0, %v2227_v41  ;;  %v2229_v42 = vpop.eup %2228 }
 0xd9e   :  { %2230 = vrcp.f32 %v1285_v62 }
 0xd9f   :  { %2232 = vpow2.f32 %v1665_v51  ;;  %v1541_v51 = vld [vmem:[%s2747_s10] sm:$0xff] }
 0xda8   :  { %v2231_v45 = vpop.eup %2230 }
 0xda9   :  { %v1299_v46 = vmul.f32 %v2231_v45, %v2229_v42  ;;  %v1298_v47 = vmul.f32 %v2231_v45, %v1296_v43  ;;  %v2233_v52 = vpop.eup %2232  ;;  %v1458_v45 = vld [vmem:[%s2745_s8 + $0x70] sm:$0xff] }
 0xdaa   :  { %v1292_v53 = vadd.f32 1.0, %v2233_v52  ;;  %v1542_v52 = vld [vmem:[%s2747_s10 + $0x8] sm:$0xff] }
 0xdab   :  { %1301 = vrot.lane.b32.xlu0 %v1299_v46, %s2315_s6  ;;  %v1459_v46 = vld [vmem:[%s2745_s8 + $0x78] sm:$0xff] }
 0xdac   :  { %2234 = vrcp.f32 %v1292_v53  ;;  %v1543_v53 = vld [vmem:[%s2747_s10 + $0x10] sm:$0xff] }
 0xdb6   :  { %v2235_v58 = vpop.eup %2234 }
 0xe1d   :  { %v1302_v56 = vpop.permute.xlu0 %1301 }
 0xe1e   :  { %v1304_v57 = vadd.f32 %v1302_v56, %v1298_v47  ;;  %v2124_v47 = vpack.c.bf16 %v1459_v46, %v1458_v45  ;;  %v2127_v56 = vpack.c.bf16 %v1542_v52, %v1541_v51 }
 0xe20   :  { %2236 = vtanh.f32 %v1304_v57  ;;  %v1406_v11 = vrot.slane %v1304_v57, 6  ;;  %v1544_v57 = vld [vmem:[%s2747_s10 + $0x18] sm:$0xff] }
 0xe21   :  { %2238 = vpow2.f32 %v1670_v63 }
 0xe2a   :  { %v2237_v59 = vpop.eup %2236 }
 0xe2b   :  { %v1306_v60 = vmul.f32 %v2237_v59, %v2235_v58  ;;  %v2239_v0 = vpop.eup %2238  ;;  %v2130_v58 = vpack.c.bf16 %v1544_v57, %v1543_v53  ;;  %v1545_v59 = vld [vmem:[%s2747_s10 + $0x20] sm:$0xff] }
 0xe2c   :  { %v1427_v3 = vadd.f32 1.0, %v2239_v0 }
 0xe2d   :  { %v1308_v61 = vrot.slane %v1306_v60, 4  ;;  %v1546_v60 = vld [vmem:[%s2747_s10 + $0x28] sm:$0xff] }
 0xe2e   :  { %2240 = vrcp.f32 %v1427_v3 }
 0xe2f   :  { %1309 = vrot.lane.b32.xlu1 %v1308_v61, %s2315_s6 }
 0xe33   :  { %1433 = vrot.lane.b32.xlu1 %v2554_v4, %s2315_s6 }
 0xe38   :  { %v2241_v9 = vpop.eup %2240 }
 0xea1   :  { %v1310_v1 = vpop.permute.xlu1 %1309 }
 0xea2   :  { %1666 = vmatmul.mubr.msk.f32.vlgmr.msra.gmra.mrb[12].mxu1 %vm556_vm0, %v1310_v1 }
 0xea3   :  { %1843 = vmatprep.mubr.msk.f32.mxu1 %vm2317_vm1, %v2314_v50  ;;  %2128 = vmatpush3.bf16.msra.mxu1 %v2127_v56  ;;  %v2133_v50 = vpack.c.bf16 %v1546_v60, %v1545_v59 }
 0xea4   :  { %2129 = vmatprep.subr.bf16.mxu1 %v2316_v22 }
 0xea5   :  { %v1434_v6 = vpop.permute.xlu1 %1433 }
 0xea6   :  { %v1436_v7 = vadd.f32 %v1434_v6, %v1430_v5  ;;  %v1547_v6 = vld [vmem:[%s2747_s10 + $0x30] sm:$0xff] }
 0xea7   :  { %2131 = vmatpush3.bf16.msra.mxu1 %v2130_v58 }
 0xea8   :  { %2242 = vtanh.f32 %v1436_v7  ;;  %2132 = vmatprep.subr.bf16.mxu1 %v2316_v22  ;;  %v1548_v7 = vld [vmem:[%s2747_s10 + $0x38] sm:$0xff] }
 0xeab   :  { %2134 = vmatpush3.bf16.msra.mxu1 %v2133_v50 }
 0xeac   :  { %2135 = vmatprep.subr.bf16.mxu1 %v2316_v22 }
 0xeb2   :  { %v2243_v10 = vpop.eup %2242 }
 0xeb3   :  { %v2636_v12 = vmul.f32 %v2243_v10, %v2241_v9  ;;  %v2136_v9 = vpack.c.bf16 %v1548_v7, %v1547_v6  ;;  %v1671_v10 = vld [vmem:[%s2746_s9] ss:$0 sm:$0xff] }
 0xeb5   :  { %2137 = vmatpush3.bf16.msra.mxu1 %v2136_v9 }
 0xf75   :  { %v1379_v13 = vpop.f32.mrb[12].mxu1 }
 0xf76   :  { %v1386_v4 = vrot.slane %v1379_v13, 2  ;;  %v1381_v14 = vpop.f32.mrb[13].mxu1 }
 0xf77   :  { %v1387_v16 = vrot.slane %v1381_v14, 2 }
 0xf78   :  { %v1390_v55 = vadd.f32 %v1386_v4, %v2538_v44  ;;  %v1444_v44 = vld [vmem:[%s2745_s8] sm:$0xff] }
 0xf79   :  { %v1391_v18 = vadd.f32 %v1387_v16, %v2540_v48  ;;  %v1446_v48 = vld [vmem:[%s2745_s8 + $0x10] sm:$0xff]  ;;  %v2103_v25 = vpack.c.bf16 %v1445_v24, %v1444_v44 }
 0xf7a   :  { %v1667_v15 = vmul.f32 -1.442695, %v1390_v55  ;;  %v2106_v28 = vpack.c.bf16 %v1447_v23, %v1446_v48  ;;  %v1672_v55 = vld [vmem:[#allocation2] ss:$0 sm:$0xff] }
 0xf7b   :  { %2104 = vmatpush3.bf16.msra.mxu0 %v2103_v25  ;;  %v1668_v40 = vmul.f32 -1.442695, %v1391_v18 }
 0xf7c   :  { %2244 = vpow2.f32 %v1667_v15  ;;  %2105 = vmatprep.subr.bf16.mxu0 %v2316_v22 }
 0xf7d   :  { %2246 = vtanh.f32 %v1391_v18 }
 0xf7f   :  { %2107 = vmatpush3.bf16.msra.mxu0 %v2106_v28 }
 0xf80   :  { %2108 = vmatprep.subr.bf16.mxu0 %v2316_v22 }
 0xf83   :  { %2110 = vmatpush3.bf16.msra.mxu0 %v2109_v29 }
 0xf84   :  { %2111 = vmatprep.subr.bf16.mxu0 %v2316_v22 }
 0xf86   :  { %v2245_v8 = vpop.eup %2244 }
 0xf87   :  { %v1395_v2 = vadd.f32 1.0, %v2245_v8  ;;  %v2247_v20 = vpop.eup %2246  ;;  %2113 = vmatpush3.bf16.msra.mxu0 %v2112_v32 }
 0xf88   :  { %2114 = vmatprep.subr.bf16.mxu0 %v2316_v22 }
 0xf89   :  { %2248 = vrcp.f32 %v1395_v2 }
 0xf8a   :  { %2250 = vpow2.f32 %v1668_v40 }
 0xf8b   :  { %2116 = vmatpush3.bf16.msra.mxu0 %v2115_v35 }
 0xf8c   :  { %2117 = vmatprep.subr.bf16.mxu0 %v2316_v22 }
 0xf8f   :  { %2119 = vmatpush3.bf16.msra.mxu0 %v2118_v38 }
 0xf90   :  { %2120 = vmatprep.subr.bf16.mxu0 %v2316_v22 }
 0xf93   :  { %v2249_v21 = vpop.eup %2248  ;;  %2122 = vmatpush3.bf16.msra.mxu0 %v2121_v54 }
 0xf94   :  { %v1409_v17 = vmul.f32 %v2249_v21, %v2247_v20  ;;  %v1408_v19 = vmul.f32 %v2249_v21, %v1406_v11  ;;  %2123 = vmatprep.subr.bf16.mxu0 %v2316_v22  ;;  %v2251_v41 = vpop.eup %2250 }
 0xf95   :  { %v1402_v62 = vadd.f32 1.0, %v2251_v41 }
 0xf96   :  { %1411 = vrot.lane.b32.xlu0 %v1409_v17, %s2315_s6 }
 0xf97   :  { %2252 = vrcp.f32 %v1402_v62  ;;  %2125 = vmatpush3.bf16.msra.mxu0 %v2124_v47 }
 0xfa1   :  { %v2253_v61 = vpop.eup %2252 }
0x1008   :  { %v1412_v42 = vpop.permute.xlu0 %1411 }
0x1009   :  { %v1414_v43 = vadd.f32 %v1412_v42, %v1408_v19 }
0x100b   :  { %2254 = vtanh.f32 %v1414_v43 }
0x1015   :  { %v2255_v63 = vpop.eup %2254 }
0x1016   :  { %v1416_v0 = vmul.f32 %v2255_v63, %v2253_v61 }
0x1018   :  { %1440 = vrot.lane.b32.xlu0 %v1416_v0, %s2315_s6 }
0x108a   :  { %v1441_v1 = vpop.permute.xlu0 %1440 }
0x108b   :  { %v1443_v3 = vsel %vm556_vm0, %v1441_v1, %v2636_v12 }
0x108c   :  { %v1468_v5 = vrot.slane %v1443_v3, 6 }
0x108e   :  { %1825 = vmatmul.mubr.f32.vlgmr.msra.gmra.mrb[16].mxu0 %v1468_v5 }
0x1161   :  { %v1536_v13 = vpop.f32.mrb[16].mxu0 }
0x1162   :  { %v1537_v4 = vadd.f32 %v1671_v10, %v1536_v13  ;;  %v1826_v14 = vpop.f32.mrb[17].mxu0 }
0x1164   :  { %v1540_v12 = vmax.f32 %v1537_v4, 0.0 }
0x1166   :  { %1844 = vmatmul.mubr.msk.f32.vlgmr.msra.gmra.mrb[14].mxu1 %vm556_vm0, %v1540_v12 }
0x1239   :  { %v1625_v15 = vpop.f32.mrb[14].mxu1 }
0x123a   :  { %v1626_v16 = vadd.f32 %v1672_v55, %v1625_v15  ;;  %v1845_v18 = vpop.f32.mrb[15].mxu1 }
0x123c   :  { %v1674_v8 = vmul.f32 -1.442695, %v1626_v16 }
0x123e   :  { %2256 = vpow2.f32 %v1674_v8 }
0x1248   :  { %v2257_v2 = vpop.eup %2256 }
0x1249   :  { %v1632_v20 = vadd.f32 1.0, %v2257_v2 }
0x124b   :  { %2258 = vrcp.f32 %v1632_v20 }
0x1255   :  { %v2259_v11 = vpop.eup %2258 }
0x1256   :  { %1636 = vst.msk [vmem:[%s2749_s12] sm:$0x3] %vm1635_vm2, %v2259_v11 }
0x1257   :  { %1641 = vsyncpa [#allocation4], 1 }
0x1258   :  { %1642 = vsyncpa [#allocation6], 1 }

</bundles_post_ra>
